<compile_context>
chip_gen: v5e
topology: v5e:2x2
jax: 0.10.0
libtpu: 0.0.40
codegen_flags: <defaults>
</compile_context>

<pallas_src>
import functools

import jax
import jax.numpy as jnp
import numpy as np
from jax.experimental import pallas as pl
from jax.experimental.pallas import tpu as pltpu

EPS = 1e-5
LANE = 128


def _round_up(x, m):
    return ((x + m - 1) // m) * m


def _pick_strip_rows(H, W):
    """Rows per output strip.

    Smallest divisor of H giving >= 256 matmul rows (amortizes MXU fill/drain)
    while still leaving >= 2 strips per image when H allows (so the strip grid
    has steps for pipelining / megacore).  Falls back to >=128 rows, then H.
    """
    for d in range(1, H + 1):
        if H % d == 0 and d * W >= 256 and d < H:
            return d
    for d in range(1, H):
        if H % d == 0 and d * W >= 128:
            return d
    return H


def _vmem_limit(need_bytes):
    try:
        cap = int(pltpu.get_tpu_info().vmem_capacity_bytes)
    except Exception:                      # pragma: no cover - conservative fallback
        cap = 64 << 20                     # v7x worst case
    cap = (cap * 3) // 4                   # headroom: ~48 MiB v7x, ~96 MiB v5e/v6e
    return int(min(max(need_bytes, 32 << 20), cap))


def _cparams(need_bytes):
    return pltpu.CompilerParams(
        dimension_semantics=("parallel", "parallel"),
        vmem_limit_bytes=_vmem_limit(need_bytes))


# --------------------------------------------------------------------------
# Pass 1: conv1 (3x3, stride 1, pad 1) + per-strip BN1 partial statistics.
# --------------------------------------------------------------------------
def _conv1_kernel(H, W, Cp, Hs, x_ref, w_ref, y_ref, s_ref):
    # x_ref: (1, H+2, W+2, Cp) bf16 -- whole padded image, VMEM-resident
    #        (constant index_map along the strip axis).
    # w_ref: (9, Cp, Cp) bf16       y_ref: (1, Hs, W, Cp) bf16 strip
    # s_ref: (1, 1, 2, Cp) f32 per-strip (sum, sum_sq)
    r0 = pl.program_id(1) * Hs
    acc = jnp.zeros((Hs * W, Cp), jnp.float32)
    for dh in range(3):                      # 9 accumulating MXU matmuls;
        for dw in range(3):                  # no materialized im2col slab.
            win = x_ref[0, pl.ds(r0 + dh, Hs), dw:dw + W, :]
            acc = acc + jnp.dot(win.reshape(Hs * W, Cp), w_ref[dh * 3 + dw],
                                preferred_element_type=jnp.float32)
    y_ref[0] = acc.reshape(Hs, W, Cp).astype(y_ref.dtype)
    ssum = jnp.sum(acc, axis=0, keepdims=True)
    ssq = jnp.sum(acc * acc, axis=0, keepdims=True)
    s_ref[0, 0] = jnp.concatenate([ssum, ssq], axis=0)


# --------------------------------------------------------------------------
# Pass 2: BN1 (folded affine) + ReLU fused into the strip  ->  conv2
#         + per-strip BN2 partial statistics.
# --------------------------------------------------------------------------
def _conv2_kernel(H, W, Cp, Hs, y1_ref, ss_ref, w_ref, y2_ref, s_ref, apad):
    # y1_ref: (1, H, W, Cp) bf16 -- whole conv1 output, VMEM-resident per image.
    # ss_ref: (2, Cp) f32 folded BN1 (scale, shift).  w_ref: (9, Cp, Cp) bf16.
    # y2_ref: (1, Hs, W, Cp) bf16     s_ref: (1, 1, 2, Cp) f32
    # apad  : (Hs+2, W+2, Cp) bf16 strip-local padded activation scratch.
    r0 = pl.program_id(1) * Hs
    scale = ss_ref[0:1, :].reshape(1, 1, Cp)
    shift = ss_ref[1:2, :].reshape(1, 1, Cp)

    def bn_relu(rows):                       # fused BN1 affine + ReLU (f32 VPU math)
        return jnp.maximum(rows.astype(jnp.float32) * scale + shift, 0.0)

    zcol = jnp.zeros((Hs + 2, 1, Cp), jnp.bfloat16)
    apad[:, 0:1, :] = zcol                   # zero ONLY the 1-pixel W halo
    apad[:, W + 1:W + 2, :] = zcol
    top = bn_relu(y1_ref[0, pl.ds(jnp.maximum(r0 - 1, 0), 1), :, :])
    bot = bn_relu(y1_ref[0, pl.ds(jnp.minimum(r0 + Hs, H - 1), 1), :, :])
    apad[0:1, 1:W + 1, :] = jnp.where(r0 > 0, top, 0.0).astype(jnp.bfloat16)
    apad[Hs + 1:Hs + 2, 1:W + 1, :] = (
        jnp.where(r0 + Hs < H, bot, 0.0).astype(jnp.bfloat16))
    apad[1:Hs + 1, 1:W + 1, :] = (
        bn_relu(y1_ref[0, pl.ds(r0, Hs), :, :]).astype(jnp.bfloat16))

    acc = jnp.zeros((Hs * W, Cp), jnp.float32)
    for dh in range(3):
        for dw in range(3):
            win = apad[dh:dh + Hs, dw:dw + W, :]
            acc = acc + jnp.dot(win.reshape(Hs * W, Cp), w_ref[dh * 3 + dw],
                                preferred_element_type=jnp.float32)
    y2_ref[0] = acc.reshape(Hs, W, Cp).astype(y2_ref.dtype)
    ssum = jnp.sum(acc, axis=0, keepdims=True)
    ssq = jnp.sum(acc * acc, axis=0, keepdims=True)
    s_ref[0, 0] = jnp.concatenate([ssum, ssq], axis=0)


# --------------------------------------------------------------------------
# Pass 3: BN2 (folded affine) + residual add + ReLU (pure elementwise strips).
# --------------------------------------------------------------------------
def _residual_kernel(Cp, y2_ref, ss_ref, x_ref, o_ref):
    scale = ss_ref[0:1, :].reshape(1, 1, 1, Cp)
    shift = ss_ref[1:2, :].reshape(1, 1, 1, Cp)
    bn2 = y2_ref[...].astype(jnp.float32) * scale + shift
    o_ref[...] = jnp.maximum(bn2 + x_ref[...].astype(jnp.float32),
                             0.0).astype(o_ref.dtype)


# --------------------------------------------------------------------------
# Wrapper (PyTorch-style NCHW in / NCHW out).
# --------------------------------------------------------------------------
def basic_block_forward(x_nchw, params):
    N, Cin, H, W = x_nchw.shape
    C = params["w1"].shape[0]
    assert Cin == C, "BasicBlock with downsample=None requires inplanes == planes"

    Cp = _round_up(max(C, LANE), LANE)          # lane-dense channel axis
    Hs = _pick_strip_rows(H, W)
    n_strips = H // Hs
    n_px = N * H * W

    # Single boundary relayout: NCHW->NHWC, channel pad, bf16.  xpad also gets
    # the 1-px spatial halo for conv1; x_id stays unpadded (aligned identity
    # read in pass 3, no halo bytes).
    x_nhwc = jnp.transpose(x_nchw, (0, 2, 3, 1))
    x_id = jnp.pad(x_nhwc, ((0, 0), (0, 0), (0, 0), (0, Cp - C))).astype(jnp.bfloat16)
    xpad = jnp.pad(x_nhwc, ((0, 0), (1, 1), (1, 1), (0, Cp - C))).astype(jnp.bfloat16)

    def prep_w(w):                              # (O,I,3,3) -> (9, Cp, Cp) bf16
        wk = jnp.transpose(w, (2, 3, 1, 0))     # (3,3,I,O)
        wk = jnp.pad(wk, ((0, 0), (0, 0), (0, Cp - w.shape[1]), (0, Cp - w.shape[0])))
        return wk.reshape(9, Cp, Cp).astype(jnp.bfloat16)

    def pad_c(v):
        return jnp.pad(v.astype(jnp.float32), (0, Cp - v.shape[0]))

    w1k, w2k = prep_w(params["w1"]), prep_w(params["w2"])
    g1, b1 = pad_c(params["gamma1"]), pad_c(params["beta1"])
    g2, b2 = pad_c(params["gamma2"]), pad_c(params["beta2"])

    # Per-step VMEM / cost bookkeeping (double-buffered blocks + kernel temps).
    img_pad_b = (H + 2) * (W + 2) * Cp * 2
    img_b = H * W * Cp * 2
    strip_b = Hs * W * Cp * 2
    w_b = 9 * Cp * Cp * 2
    stat_b = 2 * Cp * 4
    acc_b = Hs * W * Cp * 4
    apad_b = (Hs + 2) * (W + 2) * Cp * 2
    conv_flops = 2 * n_px * 9 * Cp * Cp

    # ---- pass 1: conv1 + per-strip batch stats ------------------------------
    y1, s1 = pl.pallas_call(
        functools.partial(_conv1_kernel, H, W, Cp, Hs),
        out_shape=(jax.ShapeDtypeStruct((N, H, W, Cp), jnp.bfloat16),
                   jax.ShapeDtypeStruct((N, n_strips, 2, Cp), jnp.float32)),
        grid_spec=pltpu.PrefetchScalarGridSpec(
            num_scalar_prefetch=0, grid=(N, n_strips),
            in_specs=[pl.BlockSpec((1, H + 2, W + 2, Cp), lambda n, s: (n, 0, 0, 0)),
                      pl.BlockSpec((9, Cp, Cp), lambda n, s: (0, 0, 0))],
            out_specs=[pl.BlockSpec((1, Hs, W, Cp), lambda n, s: (n, s, 0, 0)),
                       pl.BlockSpec((1, 1, 2, Cp), lambda n, s: (n, s, 0, 0))]),
        compiler_params=_cparams(2 * (img_pad_b + w_b + strip_b + stat_b)
                                 + 3 * acc_b + (8 << 20)),
        cost_estimate=pl.CostEstimate(
            flops=conv_flops, transcendentals=0,
            bytes_accessed=N * (img_pad_b + img_b) + w_b
                           + N * n_strips * 2 * Cp * 4),
    )(xpad, w1k)

    def bn_affine(stats, gamma, beta):
        # Exact training-mode BN (biased var) from per-strip partial sums.
        tot = jnp.sum(stats, axis=(0, 1))                  # (2, Cp)
        mean = tot[0] / n_px
        var = jnp.maximum(tot[1] / n_px - mean * mean, 0.0)
        scale = gamma * jax.lax.rsqrt(var + EPS)
        return jnp.stack([scale, beta - mean * scale], axis=0)   # (2, Cp) f32

    ss1 = bn_affine(s1, g1, b1)

    # ---- pass 2: fused BN1+ReLU -> conv2 + per-strip batch stats -------------
    y2, s2 = pl.pallas_call(
        functools.partial(_conv2_kernel, H, W, Cp, Hs),
        out_shape=(jax.ShapeDtypeStruct((N, H, W, Cp), jnp.bfloat16),
                   jax.ShapeDtypeStruct((N, n_strips, 2, Cp), jnp.float32)),
        grid_spec=pltpu.PrefetchScalarGridSpec(
            num_scalar_prefetch=0, grid=(N, n_strips),
            in_specs=[pl.BlockSpec((1, H, W, Cp), lambda n, s: (n, 0, 0, 0)),
                      pl.BlockSpec((2, Cp), lambda n, s: (0, 0)),
                      pl.BlockSpec((9, Cp, Cp), lambda n, s: (0, 0, 0))],
            out_specs=[pl.BlockSpec((1, Hs, W, Cp), lambda n, s: (n, s, 0, 0)),
                       pl.BlockSpec((1, 1, 2, Cp), lambda n, s: (n, s, 0, 0))],
            scratch_shapes=[pltpu.VMEM((Hs + 2, W + 2, Cp), jnp.bfloat16)]),
        compiler_params=_cparams(2 * (img_b + w_b + strip_b + 2 * stat_b)
                                 + apad_b + 3 * acc_b + (8 << 20)),
        cost_estimate=pl.CostEstimate(
            flops=conv_flops, transcendentals=0,
            bytes_accessed=2 * N * img_b + w_b + N * n_strips * 2 * Cp * 4),
    )(y1, ss1, w2k)

    ss2 = bn_affine(s2, g2, b2)

    # ---- pass 3: BN2 affine + residual add + ReLU (bf16 NHWC writeback) ------
    out_p = pl.pallas_call(
        functools.partial(_residual_kernel, Cp),
        out_shape=jax.ShapeDtypeStruct((N, H, W, Cp), jnp.bfloat16),
        grid_spec=pltpu.PrefetchScalarGridSpec(
            num_scalar_prefetch=0, grid=(N, n_strips),
            in_specs=[pl.BlockSpec((1, Hs, W, Cp), lambda n, s: (n, s, 0, 0)),
                      pl.BlockSpec((2, Cp), lambda n, s: (0, 0)),
                      pl.BlockSpec((1, Hs, W, Cp), lambda n, s: (n, s, 0, 0))],
            out_specs=pl.BlockSpec((1, Hs, W, Cp), lambda n, s: (n, s, 0, 0))),
        compiler_params=_cparams(2 * (3 * strip_b + stat_b)
                                 + 2 * acc_b + (8 << 20)),
        cost_estimate=pl.CostEstimate(flops=4 * n_px * Cp, transcendentals=0,
                                      bytes_accessed=3 * N * img_b),
    )(y2, ss2, x_id)

    # Single boundary relayout back to NCHW f32 (keep NHWC bf16 when chaining
    # BasicBlocks inside a larger network).
    return jnp.transpose(out_p[..., :C].astype(jnp.float32), (0, 3, 1, 2))


# --------------------------------------------------------------------------
# Pure-JAX f32 reference of BasicBlock.forward (training-mode BN).
# --------------------------------------------------------------------------
def reference_forward(x_nchw, params):
    dn = jax.lax.conv_dimension_numbers(x_nchw.shape, params["w1"].shape,
                                        ("NCHW", "OIHW", "NCHW"))

    def bn(y, g, b):
        mean = jnp.mean(y, axis=(0, 2, 3), keepdims=True)
        var = jnp.mean(jnp.square(y - mean), axis=(0, 2, 3), keepdims=True)
        return ((y - mean) / jnp.sqrt(var + EPS)) * g.reshape(1, -1, 1, 1) \
               + b.reshape(1, -1, 1, 1)

    out = jax.lax.conv_general_dilated(x_nchw, params["w1"], (1, 1),
                                       ((1, 1), (1, 1)), dimension_numbers=dn)
    out = jnp.maximum(bn(out, params["gamma1"], params["beta1"]), 0.0)
    out = jax.lax.conv_general_dilated(out, params["w2"], (1, 1),
                                       ((1, 1), (1, 1)), dimension_numbers=dn)
    out = bn(out, params["gamma2"], params["beta2"])
    return jnp.maximum(out + x_nchw, 0.0)


def init_params(key, inplanes, planes):
    k1, k2, k3, k4, k5, k6 = jax.random.split(key, 6)
    bound1 = 1.0 / np.sqrt(inplanes * 9)
    bound2 = 1.0 / np.sqrt(planes * 9)
    return {
        "w1": jax.random.uniform(k1, (planes, inplanes, 3, 3), jnp.float32,
                                 -bound1, bound1),
        "w2": jax.random.uniform(k2, (planes, planes, 3, 3), jnp.float32,
                                 -bound2, bound2),
        "gamma1": 1.0 + 0.1 * jax.random.normal(k3, (planes,), jnp.float32),
        "beta1": 0.1 * jax.random.normal(k4, (planes,), jnp.float32),
        "gamma2": 1.0 + 0.1 * jax.random.normal(k5, (planes,), jnp.float32),
        "beta2": 0.1 * jax.random.normal(k6, (planes,), jnp.float32),
    }


if __name__ == "__main__":
    key = jax.random.PRNGKey(0)
    kx, kp = jax.random.split(key)

    N, C, H, W = 2, 4, 16, 16          # inplanes = planes = 4, stride = 1
    x = jax.random.normal(kx, (N, C, H, W), jnp.float32)
    params = init_params(kp, C, C)

    out = jax.block_until_ready(basic_block_forward(x, params))
    ref = jax.block_until_ready(reference_forward(x, params))

    # bf16 MXU operands / bf16 intermediate & output storage vs. an f32
    # reference after two convs and two batch-norms: loosened tolerance, still
    # catches structural bugs (tap misalignment / BN error would be O(1)).
    np.testing.assert_allclose(np.asarray(out), np.asarray(ref),
                               rtol=1e-1, atol=1e-1)
    print("KERNEL_OK")
</pallas_src>

<mosaic_0001>
module attributes {stable_mosaic.version = 11 : i64} {
  func.func @_conv1_kernel(%arg0: i32, %arg1: i32, %arg2: memref<1x18x18x128xbf16, #tpu.memory_space<vmem>>, %arg3: memref<9x128x128xbf16, #tpu.memory_space<vmem>>, %arg4: memref<1x8x16x128xbf16, #tpu.memory_space<vmem>>, %arg5: memref<1x1x2x128xf32, #tpu.memory_space<vmem>>) attributes {dimension_semantics = [#tpu.dimension_semantics<parallel>, #tpu.dimension_semantics<parallel>], iteration_bounds = array<i64: 2, 2>, scalar_prefetch = 0 : i64, scratch_operands = 0 : i64, tpu.core_type = #tpu.core_type<tc>, window_params = [{transform_indices = @transform_0, window_bounds = array<i64: 1, 18, 18, 128>}, {pipeline_mode = #tpu.pipeline_mode<synchronous>, transform_indices = @transform_1, window_bounds = array<i64: 9, 128, 128>}, {transform_indices = @transform_2, window_bounds = array<i64: 1, 8, 16, 128>}, {transform_indices = @transform_3, window_bounds = array<i64: 1, 1, 2, 128>}]} {
    %c8_i32 = arith.constant 8 : i32
    %0 = arith.muli %arg1, %c8_i32 : i32
    %cst = arith.constant 0.000000e+00 : f32
    %1 = vector.broadcast %cst : f32 to vector<128x128xf32>
    %c0_i32 = arith.constant 0 : i32
    %2 = arith.addi %0, %c0_i32 : i32
    %c0 = arith.constant 0 : index
    %3 = arith.index_cast %2 : i32 to index
    %c0_0 = arith.constant 0 : index
    %c0_1 = arith.constant 0 : index
    %4 = vector.load %arg2[%c0, %3, %c0_0, %c0_1] : memref<1x18x18x128xbf16, #tpu.memory_space<vmem>>, vector<1x8x16x128xbf16>
    %5 = vector.shape_cast %4 : vector<1x8x16x128xbf16> to vector<8x16x128xbf16>
    %6 = vector.shape_cast %5 : vector<8x16x128xbf16> to vector<128x128xbf16>
    %c0_2 = arith.constant 0 : index
    %c0_3 = arith.constant 0 : index
    %c0_4 = arith.constant 0 : index
    %7 = vector.load %arg3[%c0_2, %c0_3, %c0_4] : memref<9x128x128xbf16, #tpu.memory_space<vmem>>, vector<1x128x128xbf16>
    %8 = vector.shape_cast %7 : vector<1x128x128xbf16> to vector<128x128xbf16>
    %cst_5 = arith.constant dense<0.000000e+00> : vector<128x128xf32>
    %9 = tpu.matmul %6, %8, %cst_5 {dimension_numbers = #tpu.dot_dimension_numbers<[1], [0], [0], [1], [0, 0, 1, 1], [], []>} : vector<128x128xbf16>, vector<128x128xbf16>, vector<128x128xf32> -> vector<128x128xf32>
    %10 = arith.addf %1, %9 : vector<128x128xf32>
    %c0_i32_6 = arith.constant 0 : i32
    %11 = arith.addi %0, %c0_i32_6 : i32
    %c0_7 = arith.constant 0 : index
    %12 = arith.index_cast %11 : i32 to index
    %c1 = arith.constant 1 : index
    %c0_8 = arith.constant 0 : index
    %13 = vector.load %arg2[%c0_7, %12, %c1, %c0_8] : memref<1x18x18x128xbf16, #tpu.memory_space<vmem>>, vector<1x8x16x128xbf16>
    %14 = vector.shape_cast %13 : vector<1x8x16x128xbf16> to vector<8x16x128xbf16>
    %15 = vector.shape_cast %14 : vector<8x16x128xbf16> to vector<128x128xbf16>
    %c1_9 = arith.constant 1 : index
    %c0_10 = arith.constant 0 : index
    %c0_11 = arith.constant 0 : index
    %16 = vector.load %arg3[%c1_9, %c0_10, %c0_11] : memref<9x128x128xbf16, #tpu.memory_space<vmem>>, vector<1x128x128xbf16>
    %17 = vector.shape_cast %16 : vector<1x128x128xbf16> to vector<128x128xbf16>
    %cst_12 = arith.constant dense<0.000000e+00> : vector<128x128xf32>
    %18 = tpu.matmul %15, %17, %cst_12 {dimension_numbers = #tpu.dot_dimension_numbers<[1], [0], [0], [1], [0, 0, 1, 1], [], []>} : vector<128x128xbf16>, vector<128x128xbf16>, vector<128x128xf32> -> vector<128x128xf32>
    %19 = arith.addf %10, %18 : vector<128x128xf32>
    %c0_i32_13 = arith.constant 0 : i32
    %20 = arith.addi %0, %c0_i32_13 : i32
    %c0_14 = arith.constant 0 : index
    %21 = arith.index_cast %20 : i32 to index
    %c2 = arith.constant 2 : index
    %c0_15 = arith.constant 0 : index
    %22 = vector.load %arg2[%c0_14, %21, %c2, %c0_15] : memref<1x18x18x128xbf16, #tpu.memory_space<vmem>>, vector<1x8x16x128xbf16>
    %23 = vector.shape_cast %22 : vector<1x8x16x128xbf16> to vector<8x16x128xbf16>
    %24 = vector.shape_cast %23 : vector<8x16x128xbf16> to vector<128x128xbf16>
    %c2_16 = arith.constant 2 : index
    %c0_17 = arith.constant 0 : index
    %c0_18 = arith.constant 0 : index
    %25 = vector.load %arg3[%c2_16, %c0_17, %c0_18] : memref<9x128x128xbf16, #tpu.memory_space<vmem>>, vector<1x128x128xbf16>
    %26 = vector.shape_cast %25 : vector<1x128x128xbf16> to vector<128x128xbf16>
    %cst_19 = arith.constant dense<0.000000e+00> : vector<128x128xf32>
    %27 = tpu.matmul %24, %26, %cst_19 {dimension_numbers = #tpu.dot_dimension_numbers<[1], [0], [0], [1], [0, 0, 1, 1], [], []>} : vector<128x128xbf16>, vector<128x128xbf16>, vector<128x128xf32> -> vector<128x128xf32>
    %28 = arith.addf %19, %27 : vector<128x128xf32>
    %c1_i32 = arith.constant 1 : i32
    %29 = arith.addi %0, %c1_i32 : i32
    %c0_20 = arith.constant 0 : index
    %30 = arith.index_cast %29 : i32 to index
    %c0_21 = arith.constant 0 : index
    %c0_22 = arith.constant 0 : index
    %31 = vector.load %arg2[%c0_20, %30, %c0_21, %c0_22] : memref<1x18x18x128xbf16, #tpu.memory_space<vmem>>, vector<1x8x16x128xbf16>
    %32 = vector.shape_cast %31 : vector<1x8x16x128xbf16> to vector<8x16x128xbf16>
    %33 = vector.shape_cast %32 : vector<8x16x128xbf16> to vector<128x128xbf16>
    %c3 = arith.constant 3 : index
    %c0_23 = arith.constant 0 : index
    %c0_24 = arith.constant 0 : index
    %34 = vector.load %arg3[%c3, %c0_23, %c0_24] : memref<9x128x128xbf16, #tpu.memory_space<vmem>>, vector<1x128x128xbf16>
    %35 = vector.shape_cast %34 : vector<1x128x128xbf16> to vector<128x128xbf16>
    %cst_25 = arith.constant dense<0.000000e+00> : vector<128x128xf32>
    %36 = tpu.matmul %33, %35, %cst_25 {dimension_numbers = #tpu.dot_dimension_numbers<[1], [0], [0], [1], [0, 0, 1, 1], [], []>} : vector<128x128xbf16>, vector<128x128xbf16>, vector<128x128xf32> -> vector<128x128xf32>
    %37 = arith.addf %28, %36 : vector<128x128xf32>
    %c1_i32_26 = arith.constant 1 : i32
    %38 = arith.addi %0, %c1_i32_26 : i32
    %c0_27 = arith.constant 0 : index
    %39 = arith.index_cast %38 : i32 to index
    %c1_28 = arith.constant 1 : index
    %c0_29 = arith.constant 0 : index
    %40 = vector.load %arg2[%c0_27, %39, %c1_28, %c0_29] : memref<1x18x18x128xbf16, #tpu.memory_space<vmem>>, vector<1x8x16x128xbf16>
    %41 = vector.shape_cast %40 : vector<1x8x16x128xbf16> to vector<8x16x128xbf16>
    %42 = vector.shape_cast %41 : vector<8x16x128xbf16> to vector<128x128xbf16>
    %c4 = arith.constant 4 : index
    %c0_30 = arith.constant 0 : index
    %c0_31 = arith.constant 0 : index
    %43 = vector.load %arg3[%c4, %c0_30, %c0_31] : memref<9x128x128xbf16, #tpu.memory_space<vmem>>, vector<1x128x128xbf16>
    %44 = vector.shape_cast %43 : vector<1x128x128xbf16> to vector<128x128xbf16>
    %cst_32 = arith.constant dense<0.000000e+00> : vector<128x128xf32>
    %45 = tpu.matmul %42, %44, %cst_32 {dimension_numbers = #tpu.dot_dimension_numbers<[1], [0], [0], [1], [0, 0, 1, 1], [], []>} : vector<128x128xbf16>, vector<128x128xbf16>, vector<128x128xf32> -> vector<128x128xf32>
    %46 = arith.addf %37, %45 : vector<128x128xf32>
    %c1_i32_33 = arith.constant 1 : i32
    %47 = arith.addi %0, %c1_i32_33 : i32
    %c0_34 = arith.constant 0 : index
    %48 = arith.index_cast %47 : i32 to index
    %c2_35 = arith.constant 2 : index
    %c0_36 = arith.constant 0 : index
    %49 = vector.load %arg2[%c0_34, %48, %c2_35, %c0_36] : memref<1x18x18x128xbf16, #tpu.memory_space<vmem>>, vector<1x8x16x128xbf16>
    %50 = vector.shape_cast %49 : vector<1x8x16x128xbf16> to vector<8x16x128xbf16>
    %51 = vector.shape_cast %50 : vector<8x16x128xbf16> to vector<128x128xbf16>
    %c5 = arith.constant 5 : index
    %c0_37 = arith.constant 0 : index
    %c0_38 = arith.constant 0 : index
    %52 = vector.load %arg3[%c5, %c0_37, %c0_38] : memref<9x128x128xbf16, #tpu.memory_space<vmem>>, vector<1x128x128xbf16>
    %53 = vector.shape_cast %52 : vector<1x128x128xbf16> to vector<128x128xbf16>
    %cst_39 = arith.constant dense<0.000000e+00> : vector<128x128xf32>
    %54 = tpu.matmul %51, %53, %cst_39 {dimension_numbers = #tpu.dot_dimension_numbers<[1], [0], [0], [1], [0, 0, 1, 1], [], []>} : vector<128x128xbf16>, vector<128x128xbf16>, vector<128x128xf32> -> vector<128x128xf32>
    %55 = arith.addf %46, %54 : vector<128x128xf32>
    %c2_i32 = arith.constant 2 : i32
    %56 = arith.addi %0, %c2_i32 : i32
    %c0_40 = arith.constant 0 : index
    %57 = arith.index_cast %56 : i32 to index
    %c0_41 = arith.constant 0 : index
    %c0_42 = arith.constant 0 : index
    %58 = vector.load %arg2[%c0_40, %57, %c0_41, %c0_42] : memref<1x18x18x128xbf16, #tpu.memory_space<vmem>>, vector<1x8x16x128xbf16>
    %59 = vector.shape_cast %58 : vector<1x8x16x128xbf16> to vector<8x16x128xbf16>
    %60 = vector.shape_cast %59 : vector<8x16x128xbf16> to vector<128x128xbf16>
    %c6 = arith.constant 6 : index
    %c0_43 = arith.constant 0 : index
    %c0_44 = arith.constant 0 : index
    %61 = vector.load %arg3[%c6, %c0_43, %c0_44] : memref<9x128x128xbf16, #tpu.memory_space<vmem>>, vector<1x128x128xbf16>
    %62 = vector.shape_cast %61 : vector<1x128x128xbf16> to vector<128x128xbf16>
    %cst_45 = arith.constant dense<0.000000e+00> : vector<128x128xf32>
    %63 = tpu.matmul %60, %62, %cst_45 {dimension_numbers = #tpu.dot_dimension_numbers<[1], [0], [0], [1], [0, 0, 1, 1], [], []>} : vector<128x128xbf16>, vector<128x128xbf16>, vector<128x128xf32> -> vector<128x128xf32>
    %64 = arith.addf %55, %63 : vector<128x128xf32>
    %c2_i32_46 = arith.constant 2 : i32
    %65 = arith.addi %0, %c2_i32_46 : i32
    %c0_47 = arith.constant 0 : index
    %66 = arith.index_cast %65 : i32 to index
    %c1_48 = arith.constant 1 : index
    %c0_49 = arith.constant 0 : index
    %67 = vector.load %arg2[%c0_47, %66, %c1_48, %c0_49] : memref<1x18x18x128xbf16, #tpu.memory_space<vmem>>, vector<1x8x16x128xbf16>
    %68 = vector.shape_cast %67 : vector<1x8x16x128xbf16> to vector<8x16x128xbf16>
    %69 = vector.shape_cast %68 : vector<8x16x128xbf16> to vector<128x128xbf16>
    %c7 = arith.constant 7 : index
    %c0_50 = arith.constant 0 : index
    %c0_51 = arith.constant 0 : index
    %70 = vector.load %arg3[%c7, %c0_50, %c0_51] : memref<9x128x128xbf16, #tpu.memory_space<vmem>>, vector<1x128x128xbf16>
    %71 = vector.shape_cast %70 : vector<1x128x128xbf16> to vector<128x128xbf16>
    %cst_52 = arith.constant dense<0.000000e+00> : vector<128x128xf32>
    %72 = tpu.matmul %69, %71, %cst_52 {dimension_numbers = #tpu.dot_dimension_numbers<[1], [0], [0], [1], [0, 0, 1, 1], [], []>} : vector<128x128xbf16>, vector<128x128xbf16>, vector<128x128xf32> -> vector<128x128xf32>
    %73 = arith.addf %64, %72 : vector<128x128xf32>
    %c2_i32_53 = arith.constant 2 : i32
    %74 = arith.addi %0, %c2_i32_53 : i32
    %c0_54 = arith.constant 0 : index
    %75 = arith.index_cast %74 : i32 to index
    %c2_55 = arith.constant 2 : index
    %c0_56 = arith.constant 0 : index
    %76 = vector.load %arg2[%c0_54, %75, %c2_55, %c0_56] : memref<1x18x18x128xbf16, #tpu.memory_space<vmem>>, vector<1x8x16x128xbf16>
    %77 = vector.shape_cast %76 : vector<1x8x16x128xbf16> to vector<8x16x128xbf16>
    %78 = vector.shape_cast %77 : vector<8x16x128xbf16> to vector<128x128xbf16>
    %c8 = arith.constant 8 : index
    %c0_57 = arith.constant 0 : index
    %c0_58 = arith.constant 0 : index
    %79 = vector.load %arg3[%c8, %c0_57, %c0_58] : memref<9x128x128xbf16, #tpu.memory_space<vmem>>, vector<1x128x128xbf16>
    %80 = vector.shape_cast %79 : vector<1x128x128xbf16> to vector<128x128xbf16>
    %cst_59 = arith.constant dense<0.000000e+00> : vector<128x128xf32>
    %81 = tpu.matmul %78, %80, %cst_59 {dimension_numbers = #tpu.dot_dimension_numbers<[1], [0], [0], [1], [0, 0, 1, 1], [], []>} : vector<128x128xbf16>, vector<128x128xbf16>, vector<128x128xf32> -> vector<128x128xf32>
    %82 = arith.addf %73, %81 : vector<128x128xf32>
    %83 = vector.shape_cast %82 : vector<128x128xf32> to vector<8x16x128xf32>
    %84 = arith.truncf %83 : vector<8x16x128xf32> to vector<8x16x128xbf16>
    %c0_60 = arith.constant 0 : index
    %c0_61 = arith.constant 0 : index
    %c0_62 = arith.constant 0 : index
    %c0_63 = arith.constant 0 : index
    %85 = vector.load %arg4[%c0_60, %c0_61, %c0_62, %c0_63] : memref<1x8x16x128xbf16, #tpu.memory_space<vmem>>, vector<1x8x16x128xbf16>
    %86 = vector.shape_cast %85 : vector<1x8x16x128xbf16> to vector<8x16x128xbf16>
    %87 = vector.shape_cast %84 : vector<8x16x128xbf16> to vector<1x8x16x128xbf16>
    tpu.vector_store %arg4[%c0_60, %c0_61, %c0_62, %c0_63], %87 {strides = array<i32>} : memref<1x8x16x128xbf16, #tpu.memory_space<vmem>>, vector<1x8x16x128xbf16>,
    %cst_64 = arith.constant dense<0.000000e+00> : vector<128xf32>
    %88 = vector.multi_reduction <add>, %82, %cst_64 [0] : vector<128x128xf32> to vector<128xf32>
    %89 = vector.shape_cast %88 : vector<128xf32> to vector<1x128xf32>
    %90 = arith.mulf %82, %82 : vector<128x128xf32>
    %cst_65 = arith.constant dense<0.000000e+00> : vector<128xf32>
    %91 = vector.multi_reduction <add>, %90, %cst_65 [0] : vector<128x128xf32> to vector<128xf32>
    %92 = vector.shape_cast %91 : vector<128xf32> to vector<1x128xf32>
    %93 = tpu.concatenate %89, %92 in 0 : vector<1x128xf32>, vector<1x128xf32> -> vector<2x128xf32>
    %c0_66 = arith.constant 0 : index
    %c0_67 = arith.constant 0 : index
    %c0_68 = arith.constant 0 : index
    %c0_69 = arith.constant 0 : index
    %94 = vector.load %arg5[%c0_66, %c0_67, %c0_68, %c0_69] : memref<1x1x2x128xf32, #tpu.memory_space<vmem>>, vector<1x1x2x128xf32>
    %95 = vector.shape_cast %94 : vector<1x1x2x128xf32> to vector<2x128xf32>
    %96 = vector.shape_cast %93 : vector<2x128xf32> to vector<1x1x2x128xf32>
    tpu.vector_store %arg5[%c0_66, %c0_67, %c0_68, %c0_69], %96 {strides = array<i32>} : memref<1x1x2x128xf32, #tpu.memory_space<vmem>>, vector<1x1x2x128xf32>,
    return
  }
  func.func @transform_0(%arg0: i32, %arg1: i32) -> (i32, i32, i32, i32) {
    %c0_i32 = arith.constant 0 : i32
    %c0_i32_0 = arith.constant 0 : i32
    %c0_i32_1 = arith.constant 0 : i32
    %c0_i32_2 = arith.constant 0 : i32
    return %arg0, %c0_i32, %c0_i32_0, %c0_i32_1 : i32, i32, i32, i32
  }
  func.func @transform_1(%arg0: i32, %arg1: i32) -> (i32, i32, i32) {
    %c0_i32 = arith.constant 0 : i32
    %c0_i32_0 = arith.constant 0 : i32
    %c0_i32_1 = arith.constant 0 : i32
    %c0_i32_2 = arith.constant 0 : i32
    return %c0_i32, %c0_i32_0, %c0_i32_1 : i32, i32, i32
  }
  func.func @transform_2(%arg0: i32, %arg1: i32) -> (i32, i32, i32, i32) {
    %c0_i32 = arith.constant 0 : i32
    %c0_i32_0 = arith.constant 0 : i32
    %c0_i32_1 = arith.constant 0 : i32
    return %arg0, %arg1, %c0_i32, %c0_i32_0 : i32, i32, i32, i32
  }
  func.func @transform_3(%arg0: i32, %arg1: i32) -> (i32, i32, i32, i32) {
    %c0_i32 = arith.constant 0 : i32
    %c0_i32_0 = arith.constant 0 : i32
    %c0_i32_1 = arith.constant 0 : i32
    return %arg0, %arg1, %c0_i32, %c0_i32_0 : i32, i32, i32, i32
  }
}

</mosaic_0001>

<bundles_post_ra>
// kernel: tpu_custom_call.1
= control target key start
LH: loop header
LB: loop body
LE: loop exit
PB: predicated region body
PF: predicated region fallthrough
CT: control target
= control target key end

     0   :  { %9 = vsyncpa [#allocation3], 0  ;;  %s4972_s0 = inlined_call_operand.vmem [shape: bf16[2,18,18,128], index: 0, kind: input, shape index: {}]   ;;  %s4973_s1 = inlined_call_operand.vmem [shape: bf16[9,128,128], index: 1, kind: input, shape index: {}]   ;;  %s4974_s2 = inlined_call_operand.hbm [shape: bf16[2,16,16,128], index: 2, kind: output, shape index: {0}]   ;;  %s4975_s3 = inlined_call_operand.hbm [shape: f32[2,2,2,128], index: 3, kind: output, shape index: {1}]  }
   0x1   :  { %11 = vsyncpa [#allocation3 + $0x1], 0 }
   0x2   :  { %12 = vsyncpa [#allocation5], 0 }
   0x3   :  { %14 = vsyncpa [#allocation5 + $0x1], 0  ;;  %s3935_s12 = smov 0   ;;  %s3937_s13 = smov 0  }
   0x4   :  { %s3939_s14 = smov 0   ;;  %s3941_s15 = smov 0  }
   0x5   :  { %s3943_s16 = smov 0   ;;  %s3945_s17 = smov 0  }
   0x6   :  { %s3947_s18 = smov 0   ;;  %s3949_s19 = smov 0  }
   0x7 LB: > { %s2878_s20 = sadd.s32 4294967295, %s3911_s19   ;;  %s2879_s21 = sadd.s32 4294967294, %s3911_s19   ;;  %s3911_s19 = sphi %s3949_s19, %s20_s19   ;;  %s3907_s18 = sphi %s3947_s18, %s4988_s18   ;;  %s3903_s17 = sphi %s3945_s17, %s4987_s17   ;;  %s3899_s16 = sphi %s3943_s16, %s4986_s16   ;;  %s3895_s15 = sphi %s3941_s15, %s4985_s15   ;;  %s3891_s14 = sphi %s3939_s14, %s4984_s14   ;;  %s3887_s13 = sphi %s3937_s13, %s4983_s13   ;;  %s3883_s12 = sphi %s3935_s12, %s4982_s12  }
   0x8   : > { %s29_s22 = sadd.s32 1, %s3903_s17  ;;  %s32_s23 = sadd.s32 1, %s3907_s18 }
   0x9   : > { %p30_p0 = scmp.ge.s32.totalorder %s29_s22, 2  ;;  %p98_p1 = scmp.ne.s32.totalorder %s3891_s14, %s3887_s13 }
   0xa   : > { %p99_p2 = scmp.eq.s32.totalorder %s2878_s20, 3  ;;  %p104_p5 = scmp.ne.s32.totalorder %s3887_s13, %s3883_s12 }
   0xb   : > { %s4990_s22 = smov (%p30_p0, %s29_s22), 0  ;;  %s4992_s23 = smov (!%p30_p0, %s32_s23), %s3907_s18 }
   0xc   : > { %s84_s24 = ssub.s32 %s3903_s17, %s4990_s22  ;;  %p3986_p3 = por %p99_p2, %p98_p1 }
   0xd   : > { %p34_p4 = scmp.ge.s32.totalorder %s4992_s23, 2  ;;  %p105_p6 = scmp.eq.s32.totalorder %s2879_s21, 3 }
   0xe   : > { %p2882_p7 = scmp.ge.s32.totalorder %s3911_s19, 1  ;;  %p162_p9 = scmp.lt.s32.totalorder %s3911_s19, 5 }
   0xf   : > { %s4994_s23 = smov (%p34_p4, %s4992_s23), 0  ;;  %p3995_p8 = por %p105_p6, %p104_p5 }
  0x10   : > { %s83_s27 = ssub.s32 %s3907_s18, %s4994_s23  ;;  %s88_s28 = sadd.s32 1, %s3891_s14 }
  0x11   : > { %s85_s29 = sor.u32 %s84_s24, %s83_s27  ;;  %p163_p10 = pnand %p2882_p7, %p162_p9 }
  0x12   : > { %p86_p11 = scmp.eq.s32.totalorder %s85_s29, 0  ;;  %p191_p12 = scmp.lt.s32.totalorder (!%p163_p10), %s3899_s16, 1 }
  0x13   : > { %166 = sbr.rel (%p163_p10) target bundleno = 495 (0x1ef), region = 28  ;;  %s3632_s21 = sshll.u32 (!%p163_p10), %s3895_s15, 4 }
  0x14   : > { %s4004_s30 = scalar_select %p86_p11, %s3891_s14, %s88_s28  }
  0x15   : > { %s3535_s9 = smul.u32 (!%p163_p10), 96, %s3895_s15  ;;  %s3529_s24 = sshll.u32 (!%p163_p10), %s3899_s16, 5 }
  0x18   : > { %v3559_v0 = vld [vmem:[%s4973_s1 + $0x78] sm:$0xff]  ;;  %v3558_v1 = vld [vmem:[%s4973_s1 + $0x70] sm:$0xff]  ;;  %s192_s8 = scalar_select %p191_p12, %s3899_s16, 1  ;;  %v3557_v2 = vld [vmem:[%s4973_s1 + $0x68] sm:$0xff]  ;;  %vm241_vm0 = vsmask.f32 3328 }
  0x19   : > { %3680 = vmatpush.bf16.msra.mxu1 %v3559_v0  ;;  %3681 = vmatpush.bf16.msra.mxu2 %v3559_v0  ;;  %vm242_vm1 = vsmask.f32 7440  ;;  %v3556_v3 = vld [vmem:[%s4973_s1 + $0x60] sm:$0xff]  ;;  %v3555_v30 = vld [vmem:[%s4973_s1 + $0x58] sm:$0xff]  ;;  %v3554_v50 = vld [vmem:[%s4973_s1 + $0x50] sm:$0xff]  ;;  %vm751_vm3 = vcmask 1042432  }
  0x1a   : > { %3682 = vmatpush.bf16.msra.mxu3 %v3559_v0  ;;  %533 = vmatpush.bf16.msra.mxu0 %v3559_v0  ;;  %s3704_s10 = smul.u32 216, %s192_s8  ;;  %vm4053_vm2 = vmor %vm241_vm0, %vm242_vm1  ;;  %vm752_vm4 = vcmask 1046532  }
  0x1b   : > { %vm4258_vm5 = vmor %vm751_vm3, %vm752_vm4 }
  0x1c   : > { %s195_s27 = scalar_lea.vmem %s4972_s0, %s3704_s10 }
  0x1d   : > { %3683 = vmatpush.bf16.msra.mxu1 %v3558_v1  ;;  %3684 = vmatpush.bf16.msra.mxu2 %v3558_v1  ;;  %s4021_s28 = scalar_lea.vmem %s195_s27, %s3535_s9  ;;  %s2735_s27 = sadd.s32 %s3632_s21, %s3529_s24 }
  0x1e   : > { %3685 = vmatpush.bf16.msra.mxu3 %v3558_v1  ;;  %534 = vmatpush.bf16.msra.mxu0 %v3558_v1  ;;  %v205_v4 = vld [vmem:[%s4021_s28 + $0x18] sm:$0xf]  ;;  %v4028_v5 = vld [vmem:[%s4021_s28 + $0x1c] sm:$0xf]  ;;  %v4031_v6 = vld [vmem:[%s4021_s28 + $0x20] sm:$0x1] }
  0x1f   : > { %v293_v7 = vshrl.u32 %v205_v4, 16  ;;  %v296_v8 = vshll.u32 %v205_v4, 16  ;;  %v302_v9 = vshll.u32 %v4028_v5, 16  ;;  %v306_v10 = vshrl.u32 %v4028_v5, 16  ;;  %v209_v11 = vld [vmem:[%s4021_s28 + $0x30] sm:$0xf] }
  0x20   : > { %v312_v12 = vshll.u32 %v4031_v6, 16  ;;  %v4038_v13 = vld [vmem:[%s4021_s28 + $0x34] sm:$0xf]  ;;  %v4041_v14 = vld [vmem:[%s4021_s28 + $0x38] sm:$0x1]  ;;  %v341_v15 = vshrl.u32 %v209_v11, 16 }
  0x21   : > { %3686 = vmatpush.bf16.msra.mxu1 %v3557_v2  ;;  %3687 = vmatpush.bf16.msra.mxu2 %v3557_v2  ;;  %v295_v16 = vrot.slane %v293_v7, 4  ;;  %v298_v17 = vrot.slane %v296_v8, 5  ;;  %v304_v18 = vrot.slane %v302_v9, 5  ;;  %v308_v19 = vrot.slane %v306_v10, 4  ;;  %v213_v20 = vld [vmem:[%s4021_s28 + $0x48] sm:$0xf] }
  0x22   : > { %3688 = vmatpush.bf16.msra.mxu3 %v3557_v2  ;;  %535 = vmatpush.bf16.msra.mxu0 %v3557_v2  ;;  %v314_v21 = vrot.slane %v312_v12, 5  ;;  %v343_v22 = vrot.slane %v341_v15, 4  ;;  %v344_v23 = vshll.u32 %v209_v11, 16  ;;  %v350_v24 = vshll.u32 %v4038_v13, 16  ;;  %v214_v29 = vld [vmem:[%s4021_s28 + $0x4c] sm:$0xf] }
  0x23   : > { %v299_v25 = vor.u32 %v298_v17, %v295_v16  ;;  %v309_v26 = vor.u32 %v308_v19, %v304_v18  ;;  %v354_v27 = vshrl.u32 %v4038_v13, 16  ;;  %v360_v28 = vshll.u32 %v4041_v14, 16  ;;  %v239_v41 = vld [vmem:[%s4021_s28 + $0x50] sm:$0x1]  ;;  %v201_v49 = vld [vmem:[%s4021_s28] sm:$0xf] }
  0x24   : > { %v346_v32 = vrot.slane %v344_v23, 5  ;;  %v352_v33 = vrot.slane %v350_v24, 5  ;;  %v389_v34 = vshrl.u32 %v213_v20, 16  ;;  %v392_v35 = vshll.u32 %v213_v20, 16  ;;  %v4075_v62 = vld [vmem:[%s4021_s28 + $0x4] sm:$0xf] }
  0x25   : > { %3689 = vmatpush.bf16.msra.mxu1 %v3556_v3  ;;  %3690 = vmatpush.bf16.msra.mxu2 %v3556_v3  ;;  %v300_v36 = vrot.slane %v299_v25, 4  ;;  %v310_v37 = vrot.slane %v309_v26, 4  ;;  %v356_v38 = vrot.slane %v354_v27, 4  ;;  %v362_v39 = vrot.slane %v360_v28, 5  ;;  %v4082_v4 = vld [vmem:[%s4021_s28 + $0x8] sm:$0x1] }
  0x26   : > { %3691 = vmatpush.bf16.msra.mxu3 %v3556_v3  ;;  %536 = vmatpush.bf16.msra.mxu0 %v3556_v3  ;;  %v347_v40 = vor.u32 %v346_v32, %v343_v22  ;;  %v391_v42 = vrot.slane %v389_v34, 4  ;;  %v394_v43 = vrot.slane %v392_v35, 5  ;;  %v398_v44 = vshll.u32 %v214_v29, 16  ;;  %v207_v7 = vld [vmem:[%s4021_s28 + $0x24] sm:$0xf]  ;;  %v3553_v8 = vld [vmem:[%s4973_s1 + $0x48] sm:$0xff] }
  0x27   : > { %v305_v45 = vsel %vm4053_vm2, %v300_v36, %v304_v18  ;;  %v315_v46 = vsel %vm4053_vm2, %v310_v37, %v314_v21  ;;  %v357_v47 = vor.u32 %v356_v38, %v352_v33  ;;  %v402_v48 = vshrl.u32 %v214_v29, 16  ;;  %v4097_v19 = vld [vmem:[%s4021_s28 + $0x28] sm:$0xf]  ;;  %v4103_v23 = vld [vmem:[%s4021_s28 + $0x2c] sm:$0x1]  ;;  %v3567_v36 = vld [vmem:[%s4973_s1 + $0xb8] sm:$0xff] }
  0x28   : > { %v4066_v51 = vunpack.c.l.b16 %v305_v45  ;;  %v4068_v52 = vunpack.c.l.b16 %v315_v46  ;;  %v348_v53 = vrot.slane %v347_v40, 4  ;;  %v395_v54 = vor.u32 %v394_v43, %v391_v42  ;;  %v211_v29 = vld [vmem:[%s4021_s28 + $0x3c] sm:$0xf]  ;;  %v4122_v45 = vld [vmem:[%s4021_s28 + $0x40] sm:$0xf]  ;;  %s3530_s29 = sshll.u32 %s2735_s27, 2 }
  0x29   : > { %3692 = vmatpush.bf16.msra.mxu1 %v3555_v30  ;;  %3693 = vmatpush.bf16.msra.mxu2 %v3555_v30  ;;  %v358_v55 = vrot.slane %v357_v47, 4  ;;  %v400_v56 = vrot.slane %v398_v44, 5  ;;  %v404_v57 = vrot.slane %v402_v48, 4  ;;  %v408_v58 = vshll.u32 %v239_v41, 16  ;;  %v3551_v42 = vld [vmem:[%s4973_s1 + $0x38] sm:$0xff]  ;;  %s2737_s6 = scalar_lea.hbm %s4974_s2, %s3530_s29  ;;  %s3531_s9 = sshll.u32 %s3899_s16, 1 }
  0x2a   : > { %3694 = vmatpush.bf16.msra.mxu3 %v3555_v30  ;;  %537 = vmatpush.bf16.msra.mxu0 %v3555_v30  ;;  %v471_v59 = vpack.c.b16 %v4068_v52, %v4066_v51  ;;  %v353_v60 = vsel %vm4053_vm2, %v348_v53, %v352_v33  ;;  %v396_v61 = vrot.slane %v395_v54, 4  ;;  %v245_v63 = vshrl.u32 %v201_v49, 16  ;;  %v3552_v30 = vld [vmem:[%s4973_s1 + $0x40] sm:$0xff]  ;;  %v3590_v51 = vld [vmem:[%s4973_s1 + $0x130] sm:$0xff]  ;;  %s2740_s8 = sshll.u32 %s2737_s6, 4  ;;  %s2753_s10 = sadd.s32 %s3895_s15, %s3531_s9  ;;  %s2741_s8 = int_to_ptr.hbm [resolvable:$true] %s2740_s8 }
  0x2b   : > { %v363_v0 = vsel %vm4053_vm2, %v358_v55, %v362_v39  ;;  %v4079_v1 = vunpack.c.l.b16 %v353_v60  ;;  %v405_v2 = vor.u32 %v404_v57, %v400_v56  ;;  %v410_v3 = vrot.slane %v408_v58, 5  ;;  %v4125_v53 = vld [vmem:[%s4021_s28 + $0x44] sm:$0x1]  ;;  %v3591_v55 = vld [vmem:[%s4973_s1 + $0x138] sm:$0xff]  ;;  %v215_v60 = vld [vmem:[%s4021_s28 + $0x54] sm:$0xf] }
  0x2c   : > { %v4088_v9 = vunpack.c.l.b16 %v363_v0  ;;  %v401_v10 = vsel %vm4053_vm2, %v396_v61, %v400_v56  ;;  %v247_v11 = vrot.slane %v245_v63, 4  ;;  %v248_v12 = vshll.u32 %v201_v49, 16  ;;  %v3583_v61 = vld [vmem:[%s4973_s1 + $0xf8] sm:$0xff]  ;;  %s3799_s21 = sshra.s32 %s2741_s8, 4  ;;  %s3805_s16 = scalar_lea.hbm %s4974_s2, 256  ;;  %s3800_s21 = int_to_ptr.hbm [resolvable:$true] %s3799_s21 }
  0x2d   : > { %3695 = vmatpush.bf16.msra.mxu1 %v3554_v50  ;;  %3696 = vmatpush.bf16.msra.mxu2 %v3554_v50  ;;  %v406_v15 = vrot.slane %v405_v2, 4  ;;  %v4092_v16 = vunpack.c.l.b16 %v401_v10  ;;  %v254_v17 = vshll.u32 %v4075_v62, 16  ;;  %v258_v18 = vshrl.u32 %v4075_v62, 16  ;;  %s3801_s24 = scalar_lea.hbm %s3800_s21, 64  ;;  %p3806_p2 = scmp.lt.s32.totalorder %s3800_s21, %s4974_s2 }
  0x2e   : > { %3697 = vmatpush.bf16.msra.mxu3 %v3554_v50  ;;  %538 = vmatpush.bf16.msra.mxu0 %v3554_v50  ;;  %v473_v20 = vpack.c.b16 %v4088_v9, %v4079_v1  ;;  %v250_v21 = vrot.slane %v248_v12, 5  ;;  %v264_v22 = vshll.u32 %v4082_v4, 16  ;;  %v317_v24 = vshrl.u32 %v207_v7, 16  ;;  %p3802_p13 = scmp.ne.s32.totalorder %s3800_s21, %s3801_s24  ;;  %p3807_p4 = scmp.lt.s32.totalorder %s3805_s16, %s3801_s24 }
  0x2f   : > { %v411_v25 = vsel %vm4053_vm2, %v406_v15, %v410_v3  ;;  %v256_v26 = vrot.slane %v254_v17, 5  ;;  %v260_v27 = vrot.slane %v258_v18, 4  ;;  %v320_v28 = vshll.u32 %v207_v7, 16  ;;  %v3566_v7 = vld [vmem:[%s4973_s1 + $0xb0] sm:$0xff]  ;;  %v4153_v17 = vld [vmem:[%s4021_s28 + $0x58] sm:$0xf] }
  0x30   : > { %v466_v32 = vunpack.c.l.b16 %v411_v25  ;;  %v251_v33 = vor.u32 %v250_v21, %v247_v11  ;;  %v266_v34 = vrot.slane %v264_v22, 5  ;;  %v319_v35 = vrot.slane %v317_v24, 4  ;;  %v3550_v11 = vld [vmem:[%s4973_s1 + $0x30] sm:$0xff]  ;;  %v203_v22 = vld [vmem:[%s4021_s28 + $0xc] sm:$0xf]  ;;  %p3803_p0 = pnand %p3802_p13, %p3986_p3  ;;  %p3808_p5 = por %p3807_p4, %p3806_p2 }
  0x31   : > { %3698 = vmatpush.bf16.msra.mxu1 %v3553_v8  ;;  %3699 = vmatpush.bf16.msra.mxu2 %v3553_v8  ;;  %v261_v37 = vor.u32 %v260_v27, %v256_v26  ;;  %v322_v38 = vrot.slane %v320_v28, 5  ;;  %v326_v39 = vshll.u32 %v4097_v19, 16  ;;  %v330_v40 = vshrl.u32 %v4097_v19, 16  ;;  %v3582_v24 = vld [vmem:[%s4973_s1 + $0xf0] sm:$0xff] }
  0x32   : > { %3700 = vmatpush.bf16.msra.mxu3 %v3553_v8  ;;  %539 = vmatpush.bf16.msra.mxu0 %v3553_v8  ;;  %v475_v41 = vpack.c.b16 %v466_v32, %v4092_v16  ;;  %v252_v43 = vrot.slane %v251_v33, 4  ;;  %v336_v44 = vshll.u32 %v4103_v23, 16  ;;  %v365_v46 = vshrl.u32 %v211_v29, 16  ;;  %p3804_p1 = pneg %p3803_p0 }
  0x33   : > { %v262_v47 = vrot.slane %v261_v37, 4  ;;  %v323_v48 = vor.u32 %v322_v38, %v319_v35  ;;  %v328_v49 = vrot.slane %v326_v39, 5  ;;  %v332_v50 = vrot.slane %v330_v40, 4  ;;  %v3549_v35 = vld [vmem:[%s4973_s1 + $0x28] sm:$0xff]  ;;  %v4179_v39 = vld [vmem:[%s4021_s28 + $0x10] sm:$0xf] }
  0x34   : > { %v257_v54 = vsel %vm4053_vm2, %v252_v43, %v256_v26  ;;  %v338_v56 = vrot.slane %v336_v44, 5  ;;  %v367_v57 = vrot.slane %v365_v46, 4  ;;  %v368_v58 = vshll.u32 %v211_v29, 16  ;;  %v3565_v29 = vld [vmem:[%s4973_s1 + $0xa8] sm:$0xff]  ;;  %p3809_p6 = pnand %p3808_p5, %p3804_p1 }
  0x35   : > { %3701 = vmatpush.bf16.msra.mxu1 %v3552_v30  ;;  %3702 = vmatpush.bf16.msra.mxu2 %v3552_v30  ;;  %v267_v63 = vsel %vm4053_vm2, %v262_v47, %v266_v34  ;;  %v453_v0 = vunpack.c.l.b16 %v257_v54  ;;  %v324_v1 = vrot.slane %v323_v48, 4  ;;  %v333_v2 = vor.u32 %v332_v50, %v328_v49  ;;  %v4189_v47 = vld [vmem:[%s4021_s28 + $0x14] sm:$0x1]  ;;  %v3581_v48 = vld [vmem:[%s4973_s1 + $0xe8] sm:$0xff] }
  0x36   : > { %3703 = vmatpush.bf16.msra.mxu3 %v3552_v30  ;;  %540 = vmatpush.bf16.msra.mxu0 %v3552_v30  ;;  %v454_v3 = vunpack.c.l.b16 %v267_v63  ;;  %v370_v8 = vrot.slane %v368_v58, 5  ;;  %v374_v9 = vshll.u32 %v4122_v45, 16  ;;  %v378_v10 = vshrl.u32 %v4122_v45, 16  ;;  %v3548_v63 = vld [vmem:[%s4973_s1 + $0x20] sm:$0xff] }
  0x37   : > { %v329_v12 = vsel %vm4053_vm2, %v324_v1, %v328_v49  ;;  %v334_v15 = vrot.slane %v333_v2, 4  ;;  %v384_v16 = vshll.u32 %v4125_v53, 16  ;;  %v413_v18 = vshrl.u32 %v215_v60, 16 }
  0x38   : > { %551 = vmatmul.bf16.vlgmr.msra.gmra.mxu1 %v471_v59  ;;  %561 = vmatmul.bf16.vlgmr.msra.gmra.mxu2 %v473_v20  ;;  %v469_v21 = vpack.c.b16 %v454_v3, %v453_v0  ;;  %v371_v52 = vor.u32 %v370_v8, %v367_v57  ;;  %v376_v59 = vrot.slane %v374_v9, 5  ;;  %v4159_v20 = vld [vmem:[%s4021_s28 + $0x5c] sm:$0x1]  ;;  %v4167_v26 = vunpack.c.l.b16 %v329_v12  ;;  %v3580_v12 = vld [vmem:[%s4973_s1 + $0xe0] sm:$0xff] }
  0x39   : > { %907 = vmatpush.bf16.msrb.mxu2 %v3567_v36  ;;  %678 = vmatpush.bf16.msrb.mxu1 %v3551_v42  ;;  %v339_v25 = vsel %vm4053_vm2, %v334_v15, %v338_v56  ;;  %v380_v27 = vrot.slane %v378_v10, 4  ;;  %v386_v28 = vrot.slane %v384_v16, 5  ;;  %v415_v32 = vrot.slane %v413_v18, 4  ;;  %v3564_v56 = vld [vmem:[%s4973_s1 + $0xa0] sm:$0xff] }
  0x3a   : > { %571 = vmatmul.bf16.vlgmr.msra.gmra.mxu3 %v475_v41  ;;  %1483 = vmatpush.bf16.msrb.mxu0 %v3591_v55  ;;  %v372_v30 = vrot.slane %v371_v52, 4  ;;  %v416_v33 = vshll.u32 %v215_v60, 16  ;;  %v422_v34 = vshll.u32 %v4153_v17, 16  ;;  %v426_v37 = vshrl.u32 %v4153_v17, 16  ;;  %v3589_v41 = vld [vmem:[%s4973_s1 + $0x128] sm:$0xff] }
  0x3b   : > { %1105 = vmatpush.bf16.msrb.mxu3 %v3583_v61  ;;  %541 = vmatmul.bf16.vlgmr.msra.gmra.mxu0 %v469_v21  ;;  %v381_v36 = vor.u32 %v380_v27, %v376_v59  ;;  %v432_v38 = vshll.u32 %v4159_v20, 16  ;;  %v269_v40 = vshrl.u32 %v203_v22, 16  ;;  %v4184_v42 = vunpack.c.l.b16 %v339_v25 }
  0x3c   : > { %v377_v43 = vsel %vm4053_vm2, %v372_v30, %v376_v59  ;;  %v418_v44 = vrot.slane %v416_v33, 5  ;;  %v424_v46 = vrot.slane %v422_v34, 5  ;;  %v428_v54 = vrot.slane %v426_v37, 4  ;;  %v3547_v30 = vld [vmem:[%s4973_s1 + $0x18] sm:$0xff]  ;;  %v727_v33 = vld [vmem:[%s4021_s28] sm:$0xe] }
  0x3d   : > { %908 = vmatpush.bf16.msrb.mxu2 %v3566_v7  ;;  %679 = vmatpush.bf16.msrb.mxu1 %v3550_v11  ;;  %v382_v49 = vrot.slane %v381_v36, 4  ;;  %v463_v50 = vunpack.c.l.b16 %v377_v43  ;;  %v434_v55 = vrot.slane %v432_v38, 5  ;;  %v271_v58 = vrot.slane %v269_v40, 4  ;;  %v3588_v7 = vld [vmem:[%s4973_s1 + $0x120] sm:$0xff]  ;;  %v3587_v37 = vld [vmem:[%s4973_s1 + $0x118] sm:$0xff] }
  0x3e   : > { %1484 = vmatpush.bf16.msrb.mxu0 %v3590_v51  ;;  %v419_v57 = vor.u32 %v418_v44, %v415_v32  ;;  %v272_v60 = vshll.u32 %v203_v22, 16  ;;  %v278_v61 = vshll.u32 %v4179_v39, 16  ;;  %v429_v1 = vor.u32 %v428_v54, %v424_v46  ;;  %v3563_v51 = vld [vmem:[%s4973_s1 + $0x98] sm:$0xff]  ;;  %v3155_v22 = vld [vmem:[%s4021_s28 + $0xc] sm:$0xf] }
  0x3f   : > { %1106 = vmatpush.bf16.msrb.mxu3 %v3582_v24  ;;  %v387_v0 = vsel %vm4053_vm2, %v382_v49, %v386_v28  ;;  %v282_v2 = vshrl.u32 %v4179_v39, 16  ;;  %v288_v3 = vshll.u32 %v4189_v47, 16  ;;  %v472_v18 = vpack.c.b16 %v4184_v42, %v4167_v26  ;;  %v4220_v24 = vld [vmem:[%s4021_s28 + $0x10] sm:$0xf]  ;;  %v4242_v44 = vld [vmem:[%s4021_s28 + $0x14] sm:$0x1] }
  0x40   : > { %v464_v8 = vunpack.c.l.b16 %v387_v0  ;;  %v420_v9 = vrot.slane %v419_v57, 4  ;;  %v274_v10 = vrot.slane %v272_v60, 5  ;;  %v280_v11 = vrot.slane %v278_v61, 5  ;;  %v3578_v60 = vld [vmem:[%s4973_s1 + $0xd0] sm:$0xff] }
  0x41   : > { %909 = vmatpush.bf16.msrb.mxu2 %v3565_v29  ;;  %680 = vmatpush.bf16.msrb.mxu1 %v3549_v35  ;;  %v430_v15 = vrot.slane %v429_v1, 4  ;;  %v284_v16 = vrot.slane %v282_v2, 4  ;;  %v290_v59 = vrot.slane %v288_v3, 5  ;;  %v756_v34 = vrot.slane %v4075_v62, 5  ;;  %v3579_v35 = vld [vmem:[%s4973_s1 + $0xd8] sm:$0xff]  ;;  %v3562_v62 = vld [vmem:[%s4973_s1 + $0x90] sm:$0xff] }
  0x42   : > { %1485 = vmatpush.bf16.msrb.mxu0 %v3589_v41  ;;  %v425_v21 = vsel %vm4053_vm2, %v420_v9, %v424_v46  ;;  %v275_v52 = vor.u32 %v274_v10, %v271_v58  ;;  %v474_v25 = vpack.c.b16 %v464_v8, %v463_v50  ;;  %v1195_v38 = vshrl.u32 %v3155_v22, 16  ;;  %v3586_v61 = vld [vmem:[%s4973_s1 + $0x110] sm:$0xff]  ;;  %v3561_v3 = vld [vmem:[%s4973_s1 + $0x88] sm:$0xff] }
  0x43   : > { %1107 = vmatpush.bf16.msrb.mxu3 %v3581_v48  ;;  %v435_v27 = vsel %vm4053_vm2, %v430_v15, %v434_v55  ;;  %v467_v28 = vunpack.c.l.b16 %v425_v21  ;;  %v285_v26 = vor.u32 %v284_v16, %v280_v11  ;;  %v1198_v40 = vshll.u32 %v3155_v22, 16  ;;  %v3546_v55 = vld [vmem:[%s4973_s1 + $0x10] sm:$0xff]  ;;  %v3545_v9 = vld [vmem:[%s4973_s1 + $0x8] sm:$0xff] }
  0x44   : > { %v468_v29 = vunpack.c.l.b16 %v435_v27  ;;  %v276_v32 = vrot.slane %v275_v52, 4  ;;  %v1204_v41 = vshll.u32 %v4220_v24, 16  ;;  %v3001_v49 = vrot.slane %v727_v33, 9  ;;  %v3577_v10 = vld [vmem:[%s4973_s1 + $0xc8] sm:$0xff]  ;;  %v4282_v52 = vld [vmem:[%s4021_s28 + $0x1c] sm:$0xf] }
  0x45   : > { %910 = vmatpush.bf16.msrb.mxu2 %v3564_v56  ;;  %681 = vmatpush.bf16.msrb.mxu1 %v3548_v63  ;;  %v286_v36 = vrot.slane %v285_v26, 4  ;;  %v1197_v50 = vrot.slane %v1195_v38, 4  ;;  %v758_v56 = vrot.slane %v756_v34, 4  ;;  %v759_v57 = vrot.slane %v4082_v4, 5  ;;  %v3615_v27 = vld [vmem:[%s4973_s1 + $0x1b8] sm:$0xff]  ;;  %v3544_v26 = vld [vmem:[%s4973_s1] sm:$0xff] }
  0x46   : > { %1486 = vmatpush.bf16.msrb.mxu0 %v3588_v7  ;;  %v476_v42 = vpack.c.b16 %v468_v29, %v467_v28  ;;  %v281_v43 = vsel %vm4053_vm2, %v276_v32, %v280_v11  ;;  %v1200_v58 = vrot.slane %v1198_v40, 5  ;;  %v1206_v0 = vrot.slane %v1204_v41, 5  ;;  %v3585_v11 = vld [vmem:[%s4973_s1 + $0x108] sm:$0xff]  ;;  %v3576_v33 = vld [vmem:[%s4973_s1 + $0xc0] sm:$0xff]  ;;  %v3623_v40 = vld [vmem:[%s4973_s1 + $0x1f8] sm:$0xff] }
  0x47   : > { %1108 = vmatpush.bf16.msrb.mxu3 %v3580_v12  ;;  %v291_v46 = vsel %vm4053_vm2, %v286_v36, %v290_v59  ;;  %v455_v48 = vunpack.c.l.b16 %v281_v43  ;;  %v1208_v4 = vshrl.u32 %v4220_v24, 16  ;;  %v1214_v1 = vshll.u32 %v4242_v44, 16  ;;  %v3560_v59 = vld [vmem:[%s4973_s1 + $0x80] sm:$0xff]  ;;  %v3599_v41 = vld [vmem:[%s4973_s1 + $0x178] sm:$0xff] }
  0x48   : > { %556 = vmatmul.bf16.gmra.mxu1 %v472_v18  ;;  %566 = vmatmul.bf16.gmra.mxu2 %v474_v25  ;;  %v456_v54 = vunpack.c.l.b16 %v291_v46  ;;  %v1201_v7 = vor.u32 %v1200_v58, %v1197_v50  ;;  %v757_v12 = vsel %vm4258_vm5, %v3001_v49, %v756_v34  ;;  %v760_v15 = vsel %vm4258_vm5, %v758_v56, %v759_v57  ;;  %v3584_v34 = vld [vmem:[%s4973_s1 + $0x100] sm:$0xff]  ;;  %v729_v43 = vld [vmem:[%s4021_s28 + $0x18] sm:$0xe] }
  0x49   : > { %911 = vmatpush.bf16.msrb.mxu2 %v3563_v51  ;;  %682 = vmatpush.bf16.msrb.mxu1 %v3547_v30  ;;  %v1210_v8 = vrot.slane %v1208_v4, 4  ;;  %v1216_v21 = vrot.slane %v1214_v1, 5  ;;  %v3158_v51 = vld [vmem:[%s4021_s28 + $0x18] sm:$0xf]  ;;  %v827_v22 = vunpack.c.l.b16 %v757_v12  ;;  %v828_v25 = vunpack.c.l.b16 %v760_v15 }
  0x4a   : > { %576 = vmatmul.bf16.gmra.mxu3 %v476_v42  ;;  %1487 = vmatpush.bf16.msrb.mxu0 %v3587_v37  ;;  %v470_v2 = vpack.c.b16 %v456_v54, %v455_v48  ;;  %v1202_v16 = vrot.slane %v1201_v7, 4  ;;  %v1219_v29 = vshrl.u32 %v3158_v51, 16  ;;  %v1222_v30 = vshll.u32 %v3158_v51, 16  ;;  %v728_v48 = vld [vmem:[%s4021_s28 + $0xc] sm:$0xe]  ;;  %v3631_v57 = vld [vmem:[%s4973_s1 + $0x238] sm:$0xff] }
  0x4b   : > { %1109 = vmatpush.bf16.msrb.mxu3 %v3579_v35  ;;  %v1211_v18 = vor.u32 %v1210_v8, %v1206_v0  ;;  %v1228_v32 = vshll.u32 %v4282_v52, 16  ;;  %v1232_v37 = vshrl.u32 %v4282_v52, 16  ;;  %v770_v38 = vrot.slane %v4028_v5, 5  ;;  %v3568_v54 = vld [vmem:[%s4021_s28 + $0xc] sm:$0xff] }
  0x4c   : > { %546 = vmatmul.bf16.gmra.mxu0 %v470_v2  ;;  %v1207_v35 = vsel %vm4053_vm2, %v1202_v16, %v1206_v0  ;;  %v763_v42 = vrot.slane %v4179_v39, 5  ;;  %v843_v46 = vpack.c.b16 %v828_v25, %v827_v22  ;;  %v3003_v49 = vrot.slane %v729_v43, 9  ;;  %v4331_v2 = vld [vmem:[%s4021_s28 + $0x20] sm:$0x1]  ;;  %v3598_v7 = vld [vmem:[%s4973_s1 + $0x170] sm:$0xff] }
  0x4d   : > { %912 = vmatpush.bf16.msrb.mxu2 %v3562_v62  ;;  %683 = vmatpush.bf16.msrb.mxu1 %v3546_v55  ;;  %v1212_v28 = vrot.slane %v1211_v18, 4  ;;  %v3536_v62 = vld [vmem:[%s4021_s28] sm:$0xff]  ;;  %v772_v50 = vrot.slane %v770_v38, 4  ;;  %v773_v5 = vrot.slane %v4031_v6, 5  ;;  %v1403_v55 = vunpack.c.l.b16 %v1207_v35  ;;  %v3630_v51 = vld [vmem:[%s4973_s1 + $0x230] sm:$0xff] }
  0x4e   : > { %1488 = vmatpush.bf16.msrb.mxu0 %v3586_v61  ;;  %v1221_v58 = vrot.slane %v1219_v29, 4  ;;  %v1224_v39 = vrot.slane %v1222_v30, 5  ;;  %v4324_v61 = vrot.slane %v1228_v32, 5  ;;  %v1234_v6 = vrot.slane %v1232_v37, 4  ;;  %v3161_v25 = vld [vmem:[%s4021_s28 + $0x24] sm:$0xf] }
  0x4f   : > { %1110 = vmatpush.bf16.msrb.mxu3 %v3578_v60  ;;  %v1217_v36 = vsel %vm4053_vm2, %v1212_v28, %v1216_v21  ;;  %v3614_v60 = vld [vmem:[%s4973_s1 + $0x1b0] sm:$0xff]  ;;  %v771_v0 = vsel %vm4258_vm5, %v3003_v49, %v770_v38  ;;  %v774_v4 = vsel %vm4258_vm5, %v772_v50, %v773_v5  ;;  %v3002_v1 = vrot.slane %v728_v48, 9  ;;  %v3621_v28 = vld [vmem:[%s4973_s1 + $0x1e8] sm:$0xff]  ;;  %v730_v50 = vld [vmem:[%s4021_s28 + $0x24] sm:$0xe] }
  0x50   : > { %v1404_v56 = vunpack.c.l.b16 %v1217_v36  ;;  %v831_v8 = vunpack.c.l.b16 %v771_v0  ;;  %v1225_v16 = vor.u32 %v1224_v39, %v1221_v58  ;;  %v1235_v18 = vor.u32 %v1234_v6, %v4324_v61  ;;  %v3537_v5 = vld [vmem:[%s4021_s28 + $0xc] sm:$0xff]  ;;  %v3569_v58 = vld [vmem:[%s4021_s28 + $0x18] sm:$0xff] }
  0x51   : > { %913 = vmatpush.bf16.msrb.mxu2 %v3561_v3  ;;  %684 = vmatpush.bf16.msrb.mxu1 %v3545_v9  ;;  %v3622_v3 = vld [vmem:[%s4973_s1 + $0x1f0] sm:$0xff]  ;;  %v832_v9 = vunpack.c.l.b16 %v774_v4  ;;  %v1238_v21 = vshll.u32 %v4331_v2, 16  ;;  %v1243_v36 = vshrl.u32 %v3161_v25, 16  ;;  %v1246_v37 = vshll.u32 %v3161_v25, 16 }
  0x52   : > { %1489 = vmatpush.bf16.msrb.mxu0 %v3585_v11  ;;  %v766_v11 = vrot.slane %v4189_v47, 5  ;;  %v1419_v12 = vpack.c.b16 %v1404_v56, %v1403_v55  ;;  %v3613_v47 = vld [vmem:[%s4973_s1 + $0x1a8] sm:$0xff]  ;;  %v1226_v30 = vrot.slane %v1225_v16, 4  ;;  %v1236_v32 = vrot.slane %v1235_v18, 4  ;;  %v3620_v16 = vld [vmem:[%s4973_s1 + $0x1e0] sm:$0xff] }
  0x53   : > { %1111 = vmatpush.bf16.msrb.mxu3 %v3577_v10  ;;  %v765_v10 = vrot.slane %v763_v42, 4  ;;  %v4340_v15 = vpack.c.b16 %v832_v9, %v831_v8  ;;  %v777_v43 = vrot.slane %v4097_v19, 5  ;;  %v1248_v48 = vrot.slane %v1246_v37, 5  ;;  %v3612_v9 = vld [vmem:[%s4973_s1 + $0x1a0] sm:$0xff] }
  0x54   : > { %v3004_v55 = vrot.slane %v730_v50, 9  ;;  %v3596_v18 = vld [vmem:[%s4973_s1 + $0x160] sm:$0xff] }
  0x55   : > { %914 = vmatpush.bf16.msrb.mxu2 %v3560_v59  ;;  %685 = vmatpush.bf16.msrb.mxu1 %v3544_v26  ;;  %v764_v59 = vsel %vm4258_vm5, %v3002_v1, %v763_v42  ;;  %v767_v22 = vsel %vm4258_vm5, %v765_v10, %v766_v11  ;;  %v3597_v26 = vld [vmem:[%s4973_s1 + $0x168] sm:$0xff]  ;;  %v779_v56 = vrot.slane %v777_v43, 4 }
  0x56   : > { %1490 = vmatpush.bf16.msrb.mxu0 %v3584_v34  ;;  %v829_v29 = vunpack.c.l.b16 %v764_v59  ;;  %v3629_v34 = vld [vmem:[%s4973_s1 + $0x228] sm:$0xff]  ;;  %v830_v35 = vunpack.c.l.b16 %v767_v22  ;;  %v778_v6 = vsel %vm4258_vm5, %v3004_v55, %v777_v43  ;;  %v3167_v55 = vld [vmem:[%s4021_s28 + $0x3c] sm:$0xf] }
  0x57   : > { %1112 = vmatpush.bf16.msrb.mxu3 %v3576_v33  ;;  %v1240_v33 = vrot.slane %v1238_v21, 5  ;;  %v833_v0 = vunpack.c.l.b16 %v778_v6  ;;  %v3628_v21 = vld [vmem:[%s4973_s1 + $0x220] sm:$0xff] }
  0x58   : > { %686 = vmatmul.bf16.vlgmr.msrb.gmra.mxu1 %v3536_v62  ;;  %915 = vmatmul.bf16.vlgmr.msrb.gmra.mxu2 %v843_v46  ;;  %v844_v62 = vpack.c.b16 %v830_v35, %v829_v29  ;;  %v1245_v46 = vrot.slane %v1243_v36, 4 }
  0x59   : > { %1931 = vmatpush.bf16.msra.mxu2 %v3615_v27  ;;  %1733 = vmatpush.bf16.msra.mxu1 %v3599_v41  ;;  %v4356_v27 = vld [vmem:[%s4021_s28 + $0x28] sm:$0xf]  ;;  %v1231_v41 = vsel %vm4053_vm2, %v1226_v30, %v4324_v61  ;;  %v1241_v42 = vsel %vm4053_vm2, %v1236_v32, %v1240_v33  ;;  %v4380_v61 = vld [vmem:[%s4021_s28 + $0x2c] sm:$0x1]  ;;  %v3538_v30 = vld [vmem:[%s4021_s28 + $0x18] sm:$0xff] }
  0x5a   : > { %1113 = vmatmul.bf16.vlgmr.msrb.gmra.mxu3 %v3568_v54  ;;  %2559 = vmatpush.bf16.msra.mxu0 %v3631_v57  ;;  %v1252_v38 = vshll.u32 %v4356_v27, 16  ;;  %v780_v57 = vrot.slane %v4103_v23, 5  ;;  %v1405_v39 = vunpack.c.l.b16 %v1231_v41  ;;  %v1249_v1 = vor.u32 %v1248_v48, %v1245_v46  ;;  %v3611_v46 = vld [vmem:[%s4973_s1 + $0x198] sm:$0xff] }
  0x5b   : > { %2309 = vmatpush.bf16.msra.mxu3 %v3623_v40  ;;  %v1256_v40 = vshrl.u32 %v4356_v27, 16  ;;  %v1262_v23 = vshll.u32 %v4380_v61, 16 }
  0x5c   : > { %1491 = vmatmul.bf16.vlgmr.msrb.gmra.mxu0 %v1419_v12  ;;  %v1254_v49 = vrot.slane %v1252_v38, 5  ;;  %v781_v19 = vsel %vm4258_vm5, %v779_v56, %v780_v57  ;;  %v1250_v10 = vrot.slane %v1249_v1, 4  ;;  %v4432_v56 = vld [vmem:[%s4021_s28 + $0x40] sm:$0xf]  ;;  %v3571_v1 = vld [vmem:[%s4021_s28 + $0x30] sm:$0xff] }
  0x5d   : > { %1932 = vmatpush.bf16.msra.mxu2 %v3614_v60  ;;  %1734 = vmatpush.bf16.msra.mxu1 %v3598_v7  ;;  %v1258_v54 = vrot.slane %v1256_v40, 4  ;;  %v1406_v60 = vunpack.c.l.b16 %v1241_v42  ;;  %v834_v4 = vunpack.c.l.b16 %v781_v19  ;;  %v1264_v12 = vrot.slane %v1262_v23, 5  ;;  %v4414_v40 = vld [vmem:[%s4021_s28 + $0x38] sm:$0x1] }
  0x5e   : > { %2560 = vmatpush.bf16.msra.mxu0 %v3630_v51  ;;  %v3164_v51 = vld [vmem:[%s4021_s28 + $0x30] sm:$0xf]  ;;  %v1255_v59 = vsel %vm4053_vm2, %v1250_v10, %v1254_v49  ;;  %v1300_v6 = vshll.u32 %v4432_v56, 16  ;;  %v1304_v19 = vshrl.u32 %v4432_v56, 16 }
  0x5f   : > { %2310 = vmatpush.bf16.msra.mxu3 %v3622_v3  ;;  %v1259_v3 = vor.u32 %v1258_v54, %v1254_v49  ;;  %v1420_v7 = vpack.c.b16 %v1406_v60, %v1405_v39  ;;  %v4387_v8 = vpack.c.b16 %v834_v4, %v833_v0  ;;  %v1267_v25 = vshrl.u32 %v3164_v51, 16  ;;  %v3627_v54 = vld [vmem:[%s4973_s1 + $0x218] sm:$0xff]  ;;  %v3539_v0 = vld [vmem:[%s4021_s28 + $0x24] sm:$0xff] }
  0x60   : > { %v1407_v32 = vunpack.c.l.b16 %v1255_v59  ;;  %v1291_v39 = vshrl.u32 %v3167_v55, 16  ;;  %v1294_v60 = vshll.u32 %v3167_v55, 16  ;;  %v784_v4 = vrot.slane %v4038_v13, 5  ;;  %v3610_v59 = vld [vmem:[%s4973_s1 + $0x190] sm:$0xff] }
  0x61   : > { %1933 = vmatpush.bf16.msra.mxu2 %v3613_v47  ;;  %1735 = vmatpush.bf16.msra.mxu1 %v3597_v26  ;;  %v1260_v11 = vrot.slane %v1259_v3, 4  ;;  %v4403_v47 = vld [vmem:[%s4021_s28 + $0x34] sm:$0xf]  ;;  %v1269_v35 = vrot.slane %v1267_v25, 4 }
  0x62   : > { %2561 = vmatpush.bf16.msra.mxu0 %v3629_v34  ;;  %v1276_v26 = vshll.u32 %v4403_v47, 16  ;;  %v1280_v29 = vshrl.u32 %v4403_v47, 16  ;;  %v3570_v34 = vld [vmem:[%s4021_s28 + $0x24] sm:$0xff]  ;;  %v1296_v10 = vrot.slane %v1294_v60, 5  ;;  %v791_v60 = vrot.slane %v4122_v45, 5 }
  0x63   : > { %2311 = vmatpush.bf16.msra.mxu3 %v3621_v28  ;;  %v1265_v22 = vsel %vm4053_vm2, %v1260_v11, %v1264_v12  ;;  %v1270_v28 = vshll.u32 %v3164_v51, 16  ;;  %v1302_v11 = vrot.slane %v1300_v6, 5  ;;  %v1306_v12 = vrot.slane %v1304_v19, 4  ;;  %v4480_v6 = vld [vmem:[%s4021_s28 + $0x50] sm:$0x1]  ;;  %v3609_v45 = vld [vmem:[%s4973_s1 + $0x188] sm:$0xff] }
  0x64   : > { %v1408_v33 = vunpack.c.l.b16 %v1265_v22  ;;  %v1278_v37 = vrot.slane %v1276_v26, 5  ;;  %v1282_v38 = vrot.slane %v1280_v29, 4  ;;  %v787_v51 = vrot.slane %v4041_v14, 5  ;;  %v3170_v29 = vld [vmem:[%s4021_s28 + $0x48] sm:$0xf]  ;;  %v3618_v14 = vld [vmem:[%s4973_s1 + $0x1d0] sm:$0xff] }
  0x65   : > { %1934 = vmatpush.bf16.msra.mxu2 %v3612_v9  ;;  %1736 = vmatpush.bf16.msra.mxu1 %v3596_v18  ;;  %v1272_v36 = vrot.slane %v1270_v28, 5  ;;  %v1293_v9 = vrot.slane %v1291_v39, 4  ;;  %v1307_v25 = vor.u32 %v1306_v12, %v1302_v11  ;;  %v732_v19 = vld [vmem:[%s4021_s28 + $0x3c] sm:$0xe] }
  0x66   : > { %2562 = vmatpush.bf16.msra.mxu0 %v3628_v21  ;;  %v1421_v41 = vpack.c.b16 %v1408_v33, %v1407_v32  ;;  %v1283_v43 = vor.u32 %v1282_v38, %v1278_v37  ;;  %v786_v21 = vrot.slane %v784_v4, 4  ;;  %v3594_v32 = vld [vmem:[%s4973_s1 + $0x150] sm:$0xff] }
  0x67   : > { %2312 = vmatpush.bf16.msra.mxu3 %v3620_v16  ;;  %v1273_v42 = vor.u32 %v1272_v36, %v1269_v35  ;;  %v4445_v16 = vld [vmem:[%s4021_s28 + $0x44] sm:$0x1]  ;;  %v1297_v22 = vor.u32 %v1296_v10, %v1293_v9  ;;  %v3626_v33 = vld [vmem:[%s4973_s1 + $0x210] sm:$0xff]  ;;  %v1308_v35 = vrot.slane %v1307_v25, 4  ;;  %v794_v9 = vrot.slane %v4125_v53, 5  ;;  %v3593_v53 = vld [vmem:[%s4973_s1 + $0x148] sm:$0xff] }
  0x68   : > { %691 = vmatmul.bf16.gmra.mxu1 %v3537_v5  ;;  %920 = vmatmul.bf16.gmra.mxu2 %v844_v62  ;;  %v1286_v62 = vshll.u32 %v4414_v40, 16  ;;  %v1284_v49 = vrot.slane %v1283_v43, 4  ;;  %v3595_v5 = vld [vmem:[%s4973_s1 + $0x158] sm:$0xff]  ;;  %v1310_v28 = vshll.u32 %v4445_v16, 16 }
  0x69   : > { %1935 = vmatpush.bf16.msra.mxu2 %v3611_v46  ;;  %v1274_v48 = vrot.slane %v1273_v42, 4  ;;  %1737 = vmatpush.bf16.msra.mxu1 %v3595_v5  ;;  %v1318_v42 = vshll.u32 %v3170_v29, 16 }
  0x6a   : > { %1118 = vmatmul.bf16.gmra.mxu3 %v3569_v58  ;;  %v1288_v50 = vrot.slane %v1286_v62, 5  ;;  %2563 = vmatpush.bf16.msra.mxu0 %v3627_v54  ;;  %v1312_v36 = vrot.slane %v1310_v28, 5 }
  0x6b   : > { %v1279_v57 = vsel %vm4053_vm2, %v1274_v48, %v1278_v37  ;;  %v1320_v5 = vrot.slane %v1318_v42, 5 }
  0x6c   : > { %1496 = vmatmul.bf16.gmra.mxu0 %v1420_v7  ;;  %v1289_v58 = vsel %vm4053_vm2, %v1284_v49, %v1288_v50  ;;  %v1409_v3 = vunpack.c.l.b16 %v1279_v57  ;;  %v731_v7 = vld [vmem:[%s4021_s28 + $0x30] sm:$0xe]  ;;  %v1313_v48 = vsel %vm4053_vm2, %v1308_v35, %v1312_v36  ;;  %v3572_v57 = vld [vmem:[%s4021_s28 + $0x3c] sm:$0xff]  ;;  %v3573_v36 = vld [vmem:[%s4021_s28 + $0x48] sm:$0xff] }
  0x6d   : > { %v1410_v23 = vunpack.c.l.b16 %v1289_v58  ;;  %v3005_v18 = vrot.slane %v731_v7, 9  ;;  %1936 = vmatpush.bf16.msra.mxu2 %v3610_v59  ;;  %1738 = vmatpush.bf16.msra.mxu1 %v3594_v32  ;;  %v3540_v50 = vld [vmem:[%s4021_s28 + $0x30] sm:$0xff]  ;;  %v1412_v39 = vunpack.c.l.b16 %v1313_v48  ;;  %v793_v7 = vrot.slane %v791_v60, 4  ;;  %v4500_v59 = vld [vmem:[%s4021_s28 + $0x58] sm:$0xf] }
  0x6e   : > { %2564 = vmatpush.bf16.msra.mxu0 %v3626_v33  ;;  %v1348_v32 = vshll.u32 %v4500_v59, 16  ;;  %v1352_v33 = vshrl.u32 %v4500_v59, 16 }
  0x6f   : > { %v1422_v13 = vpack.c.b16 %v1410_v23, %v1409_v3  ;;  %v785_v26 = vsel %vm4258_vm5, %v3005_v18, %v784_v4  ;;  %v3006_v23 = vrot.slane %v732_v19, 9  ;;  %v3608_v19 = vld [vmem:[%s4973_s1 + $0x180] sm:$0xff] }
  0x70   : > { %v835_v37 = vunpack.c.l.b16 %v785_v26  ;;  %v1350_v48 = vrot.slane %v1348_v32, 5 }
  0x71   : > { %1937 = vmatpush.bf16.msra.mxu2 %v3609_v45  ;;  %v792_v18 = vsel %vm4258_vm5, %v3006_v23, %v791_v60  ;;  %1739 = vmatpush.bf16.msra.mxu1 %v3593_v53  ;;  %v3176_v45 = vld [vmem:[%s4021_s28 + $0x60] sm:$0xf] }
  0x72   : > { %v1366_v53 = vshll.u32 %v3176_v45, 16 }
  0x75   : > { %1938 = vmatpush.bf16.msra.mxu2 %v3608_v19 }
  0x78   : > { %696 = vmatmul.bf16.gmra.mxu1 %v3538_v30  ;;  %925 = vmatmul.bf16.gmra.mxu2 %v4340_v15  ;;  %v3619_v15 = vld [vmem:[%s4973_s1 + $0x1d8] sm:$0xff]  ;;  %v4459_v30 = vld [vmem:[%s4021_s28 + $0x4c] sm:$0xf] }
  0x79   : > { %2313 = vmatpush.bf16.msra.mxu3 %v3619_v15  ;;  %v1324_v43 = vshll.u32 %v4459_v30, 16  ;;  %v1328_v62 = vshrl.u32 %v4459_v30, 16 }
  0x7a   : > { %1123 = vmatmul.bf16.gmra.mxu3 %v3570_v34  ;;  %v1298_v34 = vrot.slane %v1297_v22, 4  ;;  %v837_v22 = vunpack.c.l.b16 %v792_v18 }
  0x7b   : > { %v1326_v54 = vrot.slane %v1324_v43, 5  ;;  %v1330_v55 = vrot.slane %v1328_v62, 4  ;;  %v733_v43 = vld [vmem:[%s4021_s28 + $0x48] sm:$0xe] }
  0x7c   : > { %1501 = vmatmul.bf16.gmra.mxu0 %v1421_v41  ;;  %v1315_v41 = vshrl.u32 %v3170_v29, 16  ;;  %v1303_v46 = vsel %vm4053_vm2, %v1298_v34, %v1302_v11  ;;  %v3541_v34 = vld [vmem:[%s4021_s28 + $0x3c] sm:$0xff] }
  0x7d   : > { %2314 = vmatpush.bf16.msra.mxu3 %v3618_v14  ;;  %v1411_v58 = vunpack.c.l.b16 %v1303_v46  ;;  %v1331_v4 = vor.u32 %v1330_v55, %v1326_v54  ;;  %v3784_v55 = vld [vmem:[%s4021_s28 + $0x50] sm:$0x1] }
  0x7e   : > { %v1317_v15 = vrot.slane %v1315_v41, 4  ;;  %v3783_v41 = vld [vmem:[%s4021_s28 + $0x4c] sm:$0xf] }
  0x7f   : > { %v1423_v3 = vpack.c.b16 %v1412_v39, %v1411_v58  ;;  %v1332_v11 = vrot.slane %v1331_v4, 4  ;;  %v798_v42 = vrot.slane %v3783_v41, 5  ;;  %v4553_v41 = vld [vmem:[%s4021_s28 + $0x68] sm:$0x1] }
  0x88   : > { %701 = vmatmul.bf16.gmra.mxu1 %v3539_v0  ;;  %930 = vmatmul.bf16.gmra.mxu2 %v4387_v8  ;;  %v788_v8 = vsel %vm4258_vm5, %v786_v21, %v787_v51  ;;  %v1321_v0 = vor.u32 %v1320_v5, %v1317_v15  ;;  %v795_v21 = vsel %vm4258_vm5, %v793_v7, %v794_v9  ;;  %v3617_v51 = vld [vmem:[%s4973_s1 + $0x1c8] sm:$0xff]  ;;  %v3007_v5 = vrot.slane %v733_v43, 9  ;;  %v3616_v7 = vld [vmem:[%s4973_s1 + $0x1c0] sm:$0xff]  ;;  %v3389_v43 = vld [vmem:[%s4021_s28 + $0x18] sm:$0xf] }
  0x89   : > { %v836_v38 = vunpack.c.l.b16 %v788_v8  ;;  %2315 = vmatpush.bf16.msra.mxu3 %v3617_v51  ;;  %v838_v25 = vunpack.c.l.b16 %v795_v21  ;;  %v3625_v8 = vld [vmem:[%s4973_s1 + $0x208] sm:$0xff]  ;;  %v3592_v9 = vld [vmem:[%s4973_s1 + $0x140] sm:$0xff]  ;;  %v1363_v51 = vshrl.u32 %v3176_v45, 16 }
  0x8a   : > { %1128 = vmatmul.bf16.gmra.mxu3 %v3571_v1  ;;  %v1334_v1 = vshll.u32 %v4480_v6, 16  ;;  %v1322_v10 = vrot.slane %v1321_v0, 4  ;;  %2565 = vmatpush.bf16.msra.mxu0 %v3625_v8  ;;  %v799_v0 = vsel %vm4258_vm5, %v3007_v5, %v798_v42 }
  0x8b   : > { %v847_v49 = vpack.c.b16 %v836_v38, %v835_v37  ;;  %v848_v35 = vpack.c.b16 %v838_v25, %v837_v22  ;;  %1740 = vmatpush.bf16.msra.mxu1 %v3592_v9  ;;  %v3624_v25 = vld [vmem:[%s4973_s1 + $0x200] sm:$0xff] }
  0x8c   : > { %1506 = vmatmul.bf16.gmra.mxu0 %v1422_v13  ;;  %v1336_v12 = vrot.slane %v1334_v1, 5  ;;  %v3173_v13 = vld [vmem:[%s4021_s28 + $0x54] sm:$0xf]  ;;  %v1327_v28 = vsel %vm4053_vm2, %v1322_v10, %v1326_v54  ;;  %v800_v54 = vrot.slane %v798_v42, 4  ;;  %v4535_v10 = vld [vmem:[%s4021_s28 + $0x64] sm:$0xf] }
  0x8d   : > { %v1339_v29 = vshrl.u32 %v3173_v13, 16  ;;  %v1342_v14 = vshll.u32 %v3173_v13, 16  ;;  %v1413_v37 = vunpack.c.l.b16 %v1327_v28  ;;  %2316 = vmatpush.bf16.msra.mxu3 %v3616_v7  ;;  %v1372_v13 = vshll.u32 %v4535_v10, 16  ;;  %v3542_v28 = vld [vmem:[%s4021_s28 + $0x48] sm:$0xff] }
  0x8e   : > { %v1337_v26 = vsel %vm4053_vm2, %v1332_v11, %v1336_v12  ;;  %v839_v11 = vunpack.c.l.b16 %v799_v0  ;;  %v1376_v22 = vshrl.u32 %v4535_v10, 16  ;;  %2566 = vmatpush.bf16.msra.mxu0 %v3624_v25  ;;  %v1582_v25 = vrot.slane %v4220_v24, 5 }
  0x8f   : > { %v1414_v38 = vunpack.c.l.b16 %v1337_v26  ;;  %v1341_v62 = vrot.slane %v1339_v29, 4  ;;  %v1344_v46 = vrot.slane %v1342_v14, 5  ;;  %v3574_v29 = vld [vmem:[%s4021_s28 + $0x54] sm:$0xff] }
  0x90   : > { %v1584_v24 = vrot.slane %v1582_v25, 4 }
  0x91   : > { %v1424_v15 = vpack.c.b16 %v1414_v38, %v1413_v37  ;;  %v1345_v58 = vor.u32 %v1344_v46, %v1341_v62  ;;  %v1374_v37 = vrot.slane %v1372_v13, 5  ;;  %v1378_v38 = vrot.slane %v1376_v22, 4 }
  0x93   : > { %v1346_v1 = vrot.slane %v1345_v58, 4  ;;  %v1379_v5 = vor.u32 %v1378_v38, %v1374_v37  ;;  %v2024_v58 = vshll.u32 %v3389_v43, 16 }
  0x95   : > { %v1351_v18 = vsel %vm4053_vm2, %v1346_v1, %v1350_v48  ;;  %v2026_v9 = vrot.slane %v2024_v58, 5  ;;  %v3392_v58 = vld [vmem:[%s4021_s28 + $0x24] sm:$0xf] }
  0x96   : > { %v1415_v14 = vunpack.c.l.b16 %v1351_v18 }
  0x98   : > { %706 = vmatmul.bf16.gmra.mxu1 %v3540_v50  ;;  %935 = vmatmul.bf16.gmra.mxu2 %v847_v49  ;;  %v1354_v49 = vrot.slane %v1352_v33, 4  ;;  %v4516_v50 = vld [vmem:[%s4021_s28 + $0x5c] sm:$0x1]  ;;  %v805_v33 = vrot.slane %v4153_v17, 5 }
  0x99   : > { %v1358_v60 = vshll.u32 %v4516_v50, 16  ;;  %v4560_v17 = vld [vmem:[%s4021_s28 + $0x1c] sm:$0xf] }
  0x9a   : > { %1133 = vmatmul.bf16.gmra.mxu3 %v3572_v57  ;;  %v801_v57 = vrot.slane %v3784_v55, 5  ;;  %v1355_v39 = vor.u32 %v1354_v49, %v1350_v48  ;;  %v807_v48 = vrot.slane %v805_v33, 4  ;;  %v808_v49 = vrot.slane %v4159_v20, 5 }
  0x9b   : > { %v1360_v23 = vrot.slane %v1358_v60, 5  ;;  %v2030_v60 = vshll.u32 %v4560_v17, 16  ;;  %v2034_v19 = vshrl.u32 %v4560_v17, 16 }
  0x9c   : > { %1511 = vmatmul.bf16.gmra.mxu0 %v1423_v3  ;;  %v802_v4 = vsel %vm4258_vm5, %v800_v54, %v801_v57  ;;  %v1356_v3 = vrot.slane %v1355_v39, 4  ;;  %v1382_v54 = vshll.u32 %v4553_v41, 16  ;;  %v2021_v57 = vshrl.u32 %v3389_v43, 16 }
  0x9d   : > { %v840_v12 = vunpack.c.l.b16 %v802_v4  ;;  %v809_v4 = vsel %vm4258_vm5, %v807_v48, %v808_v49  ;;  %v2032_v18 = vrot.slane %v2030_v60, 5  ;;  %v1585_v43 = vrot.slane %v4242_v44, 5  ;;  %v4599_v60 = vld [vmem:[%s4021_s28 + $0x28] sm:$0xf] }
  0x9e   : > { %v1361_v21 = vsel %vm4053_vm2, %v1356_v3, %v1360_v23  ;;  %v1380_v3 = vrot.slane %v1379_v5, 4  ;;  %v1384_v23 = vrot.slane %v1382_v54, 5  ;;  %v2023_v7 = vrot.slane %v2021_v57, 4  ;;  %v3461_v54 = vld [vmem:[%s4021_s28 + $0x18] sm:$0xe] }
  0x9f   : > { %v849_v26 = vpack.c.b16 %v840_v12, %v839_v11  ;;  %v1416_v32 = vunpack.c.l.b16 %v1361_v21  ;;  %v842_v12 = vunpack.c.l.b16 %v809_v4  ;;  %v2036_v21 = vrot.slane %v2034_v19, 4 }
  0xa0   : > { %v1385_v13 = vsel %vm4053_vm2, %v1380_v3, %v1384_v23  ;;  %v3469_v3 = vrot.slane %v3461_v54, 9  ;;  %v3228_v54 = vld [vmem:[%s4021_s28 + $0x18] sm:$0xe] }
  0xa1   : > { %v1425_v62 = vpack.c.b16 %v1416_v32, %v1415_v14  ;;  %v3227_v32 = vld [vmem:[%s4021_s28 + $0xc] sm:$0xe]  ;;  %v1418_v38 = vunpack.c.l.b16 %v1385_v13 }
  0xa8   : > { %711 = vmatmul.bf16.gmra.mxu1 %v3541_v34  ;;  %940 = vmatmul.bf16.gmra.mxu2 %v848_v35  ;;  %v734_v34 = vld [vmem:[%s4021_s28 + $0x54] sm:$0xe]  ;;  %v1365_v35 = vrot.slane %v1363_v51, 4  ;;  %v3391_v51 = vld [vmem:[%s4021_s28 + $0x20] sm:$0x1] }
  0xa9   : > { %v3008_v46 = vrot.slane %v734_v34, 9  ;;  %v2040_v34 = vshll.u32 %v3391_v51, 16 }
  0xaa   : > { %1138 = vmatmul.bf16.gmra.mxu3 %v3573_v36  ;;  %v1368_v36 = vrot.slane %v1366_v53, 5 }
  0xab   : > { %v806_v20 = vsel %vm4258_vm5, %v3008_v46, %v805_v33  ;;  %v2037_v33 = vor.u32 %v2036_v21, %v2032_v18  ;;  %v2042_v49 = vrot.slane %v2040_v34, 5  ;;  %v2054_v21 = vshll.u32 %v4599_v60, 16 }
  0xac   : > { %1516 = vmatmul.bf16.gmra.mxu0 %v1424_v15  ;;  %v1369_v15 = vor.u32 %v1368_v36, %v1365_v35  ;;  %v841_v11 = vunpack.c.l.b16 %v806_v20  ;;  %v3575_v36 = vld [vmem:[%s4021_s28 + $0x60] sm:$0xff]  ;;  %v1586_v20 = vsel %vm4258_vm5, %v1584_v24, %v1585_v43  ;;  %v3600_v24 = vld [vmem:[%s4021_s28 + $0x18] sm:$0xff] }
  0xad   : > { %v2038_v48 = vrot.slane %v2037_v33, 4  ;;  %v1654_v13 = vunpack.c.l.b16 %v1586_v20  ;;  %v2056_v33 = vrot.slane %v2054_v21, 5 }
  0xae   : > { %v1370_v1 = vrot.slane %v1369_v15, 4  ;;  %v850_v14 = vpack.c.b16 %v842_v12, %v841_v11  ;;  %v2408_v15 = vrot.slane %v4560_v17, 5  ;;  %v2045_v11 = vshrl.u32 %v3392_v58, 16 }
  0xaf   : > { %v2048_v12 = vshll.u32 %v3392_v58, 16 }
  0xb0   : > { %v1375_v53 = vsel %vm4053_vm2, %v1370_v1, %v1374_v37  ;;  %v2043_v1 = vsel %vm4053_vm2, %v2038_v48, %v2042_v49  ;;  %v2410_v23 = vrot.slane %v2408_v15, 4  ;;  %v1589_v49 = vrot.slane %v4282_v52, 5 }
  0xb1   : > { %v1417_v37 = vunpack.c.l.b16 %v1375_v53  ;;  %v2058_v53 = vshrl.u32 %v4599_v60, 16  ;;  %v1592_v52 = vrot.slane %v4331_v2, 5 }
  0xb3   : > { %v1426_v5 = vpack.c.b16 %v1418_v38, %v1417_v37  ;;  %v2060_v34 = vrot.slane %v2058_v53, 4  ;;  %v3394_v37 = vld [vmem:[%s4021_s28 + $0x2c] sm:$0x1] }
  0xb4   : > { %v2064_v20 = vshll.u32 %v3394_v37, 16 }
  0xb5   : > { %v4547_v8 = vpop.f32.mrf.mxu1 }
  0xb6   : > { %v2066_v53 = vrot.slane %v2064_v20, 5 }
  0xb8   : > { %v4555_v42 = vpop.f32.mrf.mxu0  ;;  %716 = vmatmul.bf16.gmra.mxu1 %v3542_v28  ;;  %945 = vmatmul.bf16.gmra.mxu2 %v849_v26  ;;  %v2027_v28 = vor.u32 %v2026_v9, %v2023_v7  ;;  %v2411_v7 = vrot.slane %v3391_v51, 5 }
  0xba   : > { %1143 = vmatmul.bf16.gmra.mxu3 %v3574_v29  ;;  %v3543_v29 = vld [vmem:[%s4021_s28 + $0x54] sm:$0xff]  ;;  %v2028_v46 = vrot.slane %v2027_v28, 4  ;;  %v2230_v28 = vunpack.c.l.b16 %v2043_v1  ;;  %v2412_v51 = vsel %vm4258_vm5, %v2410_v23, %v2411_v7  ;;  %v1591_v23 = vrot.slane %v1589_v49, 4  ;;  %v3395_v7 = vld [vmem:[%s4021_s28 + $0x30] sm:$0xf] }
  0xbb   : > { %v4563_v55 = vpop.f32.mrf.mxu2  ;;  %v2480_v48 = vunpack.c.l.b16 %v2412_v51 }
  0xbc   : > { %1521 = vmatmul.bf16.gmra.mxu0 %v1425_v62  ;;  %v3235_v62 = vrot.slane %v3227_v32, 9  ;;  %v2033_v4 = vsel %vm4053_vm2, %v2028_v46, %v2032_v18  ;;  %v2050_v32 = vrot.slane %v2048_v12, 5 }
  0xbd   : > { %v4565_v39 = vpop.f32.mrf.mxu3  ;;  %v4569_v0 = vpop.f32.mrf.mxu1 }
  0xbe   : > { %v1583_v44 = vsel %vm4258_vm5, %v3235_v62, %v1582_v25  ;;  %v2229_v25 = vunpack.c.l.b16 %v2033_v4 }
  0xbf   : > { %v1653_v18 = vunpack.c.l.b16 %v1583_v44  ;;  %v2061_v44 = vor.u32 %v2060_v34, %v2056_v33 }
  0xc0   : > { %v4575_v45 = vpop.f32.mrf.mxu0 }
  0xc1   : > { %v1669_v62 = vpack.c.b16 %v1654_v13, %v1653_v18  ;;  %v2062_v21 = vrot.slane %v2061_v44, 4  ;;  %v3462_v13 = vld [vmem:[%s4021_s28 + $0x24] sm:$0xe] }
  0xc3   : > { %v4582_v22 = vpop.f32.mrf.mxu2 }
  0xc5   : > { %v4585_v26 = vpop.f32.mrf.mxu3  ;;  %v4589_v35 = vpop.f32.mrf.mxu1 }
  0xc8   : > { %721 = vmatmul.bf16.gmra.mxu1 %v3543_v29  ;;  %950 = vmatmul.bf16.gmra.mxu2 %v850_v14  ;;  %v2409_v29 = vsel %vm4258_vm5, %v3469_v3, %v2408_v15  ;;  %v2047_v14 = vrot.slane %v2045_v11, 4  ;;  %v3236_v3 = vrot.slane %v3228_v54, 9  ;;  %v4634_v11 = vld [vmem:[%s4021_s28 + $0x34] sm:$0xf] }
  0xc9   : > { %v4595_v57 = vpop.f32.mrf.mxu0  ;;  %v2479_v46 = vunpack.c.l.b16 %v2409_v29  ;;  %v2072_v29 = vshll.u32 %v3395_v7, 16  ;;  %v2078_v51 = vshll.u32 %v4634_v11, 16 }
  0xca   : > { %1148 = vmatmul.bf16.gmra.mxu3 %v3575_v36  ;;  %v2051_v58 = vor.u32 %v2050_v32, %v2047_v14  ;;  %v2082_v14 = vshrl.u32 %v4634_v11, 16 }
  0xcb   : > { %v4601_v19 = vpop.f32.mrf.mxu2  ;;  %v2495_v1 = vpack.c.b16 %v2480_v48, %v2479_v46  ;;  %v2067_v46 = vsel %vm4053_vm2, %v2062_v21, %v2066_v53  ;;  %v3470_v48 = vrot.slane %v3462_v13, 9  ;;  %v2074_v44 = vrot.slane %v2072_v29, 5  ;;  %v3229_v13 = vld [vmem:[%s4021_s28 + $0x24] sm:$0xe] }
  0xcc   : > { %1526 = vmatmul.bf16.gmra.mxu0 %v1426_v5  ;;  %v2245_v5 = vpack.c.b16 %v2230_v28, %v2229_v25  ;;  %v2052_v12 = vrot.slane %v2051_v58, 4  ;;  %v2415_v25 = vrot.slane %v4599_v60, 5  ;;  %v2418_v58 = vrot.slane %v3394_v37, 5 }
  0xcd   : > { %v4609_v17 = vpop.f32.mrf.mxu3  ;;  %v4613_v9 = vpop.f32.mrf.mxu1  ;;  %v4650_v20 = vrot.slane %v2078_v51, 5  ;;  %v1596_v21 = vrot.slane %v4356_v27, 5 }
  0xce   : > { %v2057_v60 = vsel %vm4053_vm2, %v2052_v12, %v2056_v33  ;;  %v2417_v54 = vrot.slane %v2415_v25, 4 }
  0xd0   : > { %v2419_v37 = vsel %vm4258_vm5, %v2417_v54, %v2418_v58  ;;  %v2422_v58 = vrot.slane %v4634_v11, 5 }
  0xd1   : > { %v4621_v36 = vpop.f32.mrf.mxu0 }
  0xd3   : > { %v4624_v38 = vpop.f32.mrf.mxu2 }
  0xd5   : > { %v4626_v43 = vpop.f32.mrf.mxu3  ;;  %v687_v15 = vpop.f32.mrf.mxu1 }
  0xd6   : > { %v688_v4 = vadd.f32 %v687_v15, %v4555_v42  ;;  %v2069_v42 = vshrl.u32 %v3395_v7, 16  ;;  %v2231_v7 = vunpack.c.l.b16 %v2057_v60  ;;  %v3237_v60 = vrot.slane %v3229_v13, 9 }
  0xd7   : > { %v2424_v13 = vrot.slane %v2422_v58, 4 }
  0xd8   : > { %1741 = vmatmul.bf16.vlgmr.msra.gmra.mxu1 %v1669_v62  ;;  %1939 = vmatmul.bf16.vlgmr.msra.gmra.mxu2 %v3600_v24  ;;  %v1590_v62 = vsel %vm4258_vm5, %v3236_v3, %v1589_v49  ;;  %v1593_v24 = vsel %vm4258_vm5, %v1591_v23, %v1592_v52  ;;  %v2071_v49 = vrot.slane %v2069_v42, 4  ;;  %v4653_v23 = vld [vmem:[%s4021_s28 + $0x38] sm:$0x1]  ;;  %v2232_v52 = vunpack.c.l.b16 %v2067_v46 }
  0xd9   : > { %v1492_v18 = vpop.f32.mrf.mxu0  ;;  %v1656_v3 = vunpack.c.l.b16 %v1593_v24  ;;  %v2088_v29 = vshll.u32 %v4653_v23, 16  ;;  %v1598_v46 = vrot.slane %v1596_v21, 4 }
  0xda   : > { %2317 = vmatmul.bf16.vlgmr.msra.gmra.mxu3 %v2245_v5 }
  0xdb   : > { %v916_v28 = vpop.f32.mrf.mxu2 }
  0xdc   : > { %v956_v32 = vadd.f32 %v916_v28, %v688_v4  ;;  %2567 = vmatmul.bf16.vlgmr.msra.gmra.mxu0 %v2495_v1  ;;  %v2084_v4 = vrot.slane %v2082_v14, 4  ;;  %v1655_v1 = vunpack.c.l.b16 %v1590_v62  ;;  %v2075_v28 = vor.u32 %v2074_v44, %v2071_v49  ;;  %v3463_v44 = vld [vmem:[%s4021_s28 + $0x30] sm:$0xe] }
  0xdd   : > { %v1114_v34 = vpop.f32.mrf.mxu3  ;;  %v689_v2 = vpop.f32.mrf.mxu1  ;;  %v2246_v62 = vpack.c.b16 %v2232_v52, %v2231_v7 }
  0xde   : > { %v1154_v15 = vadd.f32 %v1114_v34, %v956_v32  ;;  %v690_v5 = vadd.f32 %v689_v2, %v4575_v45  ;;  %v2416_v45 = vsel %vm4258_vm5, %v3470_v48, %v2415_v25  ;;  %v2085_v42 = vor.u32 %v2084_v4, %v4650_v20  ;;  %v3601_v32 = vld [vmem:[%s4021_s28 + $0x24] sm:$0xff] }
  0xdf   : > { %v1670_v14 = vpack.c.b16 %v1656_v3, %v1655_v1  ;;  %v2481_v25 = vunpack.c.l.b16 %v2416_v45  ;;  %v2482_v2 = vunpack.c.l.b16 %v2419_v37  ;;  %v1599_v48 = vrot.slane %v4380_v61, 5  ;;  %v3398_v3 = vld [vmem:[%s4021_s28 + $0x3c] sm:$0xf] }
  0xe0   : > { %v4655_v33 = vadd.f32 %v1492_v18, %v1154_v15  ;;  %v2076_v15 = vrot.slane %v2075_v28, 4  ;;  %v2086_v54 = vrot.slane %v2085_v42, 4  ;;  %v1597_v61 = vsel %vm4258_vm5, %v3237_v60, %v1596_v21 }
  0xe1   : > { %v1494_v12 = vpop.f32.mrf.mxu0  ;;  %v2496_v49 = vpack.c.b16 %v2482_v2, %v2481_v25  ;;  %v1600_v52 = vsel %vm4258_vm5, %v1598_v46, %v1599_v48  ;;  %v2425_v28 = vrot.slane %v4653_v23, 5  ;;  %v2096_v21 = vshll.u32 %v3398_v3, 16 }
  0xe2   : > { %v2081_v11 = vsel %vm4053_vm2, %v2076_v15, %v4650_v20 }
  0xe3   : > { %v918_v53 = vpop.f32.mrf.mxu2  ;;  %v2426_v2 = vsel %vm4258_vm5, %v2424_v13, %v2425_v28  ;;  %v2098_v60 = vrot.slane %v2096_v21, 5  ;;  %v1606_v21 = vrot.slane %v4414_v40, 5 }
  0xe4   : > { %v957_v18 = vadd.f32 %v918_v53, %v690_v5  ;;  %v2090_v5 = vrot.slane %v2088_v29, 5  ;;  %v3471_v53 = vrot.slane %v3463_v44, 9  ;;  %v2093_v29 = vshrl.u32 %v3398_v3, 16  ;;  %v3602_v3 = vld [vmem:[%s4021_s28 + $0x30] sm:$0xff] }
  0xe5   : > { %v1116_v51 = vpop.f32.mrf.mxu3  ;;  %v692_v34 = vpop.f32.mrf.mxu1 }
  0xe6   : > { %v1155_v24 = vadd.f32 %v1116_v51, %v957_v18  ;;  %v693_v27 = vadd.f32 %v692_v34, %v4595_v57  ;;  %v4674_v57 = vld [vmem:[%s4021_s28 + $0x40] sm:$0xf]  ;;  %v2091_v45 = vsel %vm4053_vm2, %v2086_v54, %v2090_v5  ;;  %v1658_v34 = vunpack.c.l.b16 %v1600_v52 }
  0xe7   : > { %v2102_v18 = vshll.u32 %v4674_v57, 16  ;;  %v2106_v51 = vshrl.u32 %v4674_v57, 16  ;;  %v2234_v25 = vunpack.c.l.b16 %v2091_v45  ;;  %v2423_v23 = vsel %vm4258_vm5, %v3471_v53, %v2422_v58 }
  0xe8   : > { %1746 = vmatmul.bf16.gmra.mxu1 %v1670_v14  ;;  %1944 = vmatmul.bf16.gmra.mxu2 %v3601_v32  ;;  %v4670_v4 = vadd.f32 %v1494_v12, %v1155_v24  ;;  %v1657_v32 = vunpack.c.l.b16 %v1597_v61  ;;  %v2484_v58 = vunpack.c.l.b16 %v2426_v2  ;;  %v3230_v61 = vld [vmem:[%s4021_s28 + $0x30] sm:$0xe] }
  0xe9   : > { %v1497_v1 = vpop.f32.mrf.mxu0  ;;  %v2104_v46 = vrot.slane %v2102_v18, 5  ;;  %v2108_v48 = vrot.slane %v2106_v51, 4  ;;  %v3238_v28 = vrot.slane %v3230_v61, 9  ;;  %v3401_v18 = vld [vmem:[%s4021_s28 + $0x48] sm:$0xf] }
  0xea   : > { %2322 = vmatmul.bf16.gmra.mxu3 %v2246_v62  ;;  %v2233_v62 = vunpack.c.l.b16 %v2081_v11  ;;  %v1671_v5 = vpack.c.b16 %v1658_v34, %v1657_v32  ;;  %v4706_v51 = vld [vmem:[%s4021_s28 + $0x4c] sm:$0xf]  ;;  %v2120_v2 = vshll.u32 %v3401_v18, 16 }
  0xeb   : > { %v921_v7 = vpop.f32.mrf.mxu2  ;;  %v2130_v40 = vshrl.u32 %v4706_v51, 16 }
  0xec   : > { %v958_v12 = vadd.f32 %v921_v7, %v693_v27  ;;  %2572 = vmatmul.bf16.gmra.mxu0 %v2496_v49  ;;  %v2095_v27 = vrot.slane %v2093_v29, 4  ;;  %v2483_v7 = vunpack.c.l.b16 %v2423_v23  ;;  %v2247_v11 = vpack.c.b16 %v2234_v25, %v2233_v62  ;;  %v3464_v62 = vld [vmem:[%s4021_s28 + $0x3c] sm:$0xe] }
  0xed   : > { %v1119_v37 = vpop.f32.mrf.mxu3  ;;  %v694_v42 = vpop.f32.mrf.mxu1  ;;  %v2117_v23 = vshrl.u32 %v3401_v18, 16  ;;  %v3231_v18 = vld [vmem:[%s4021_s28 + $0x3c] sm:$0xe] }
  0xee   : > { %v1156_v14 = vadd.f32 %v1119_v37, %v958_v12  ;;  %v695_v20 = vadd.f32 %v694_v42, %v4621_v36  ;;  %v4696_v36 = vld [vmem:[%s4021_s28 + $0x44] sm:$0x1]  ;;  %v2099_v45 = vor.u32 %v2098_v60, %v2095_v27  ;;  %v2109_v12 = vor.u32 %v2108_v48, %v2104_v46 }
  0xef   : > { %v2112_v37 = vshll.u32 %v4696_v36, 16  ;;  %v2497_v42 = vpack.c.b16 %v2484_v58, %v2483_v7  ;;  %v2126_v27 = vshll.u32 %v4706_v51, 16  ;;  %v2432_v61 = vrot.slane %v4696_v36, 5 }
  0xf0   : > { %v4693_v24 = vadd.f32 %v1497_v1, %v1156_v14  ;;  %v1603_v1 = vrot.slane %v4403_v47, 5  ;;  %v2100_v47 = vrot.slane %v2099_v45, 4  ;;  %v2110_v14 = vrot.slane %v2109_v12, 4 }
  0xf1   : > { %v1499_v15 = vpop.f32.mrf.mxu0  ;;  %v2132_v45 = vrot.slane %v2130_v40, 4 }
  0xf2   : > { %v1605_v29 = vrot.slane %v1603_v1, 4 }
  0xf3   : > { %v923_v54 = vpop.f32.mrf.mxu2 }
  0xf4   : > { %v959_v49 = vadd.f32 %v923_v54, %v695_v20  ;;  %v2114_v20 = vrot.slane %v2112_v37, 5  ;;  %v1604_v54 = vsel %vm4258_vm5, %v3238_v28, %v1603_v1  ;;  %v2119_v1 = vrot.slane %v2117_v23, 4  ;;  %v3603_v23 = vld [vmem:[%s4021_s28 + $0x3c] sm:$0xff] }
  0xf5   : > { %v1121_v44 = vpop.f32.mrf.mxu3  ;;  %v697_v52 = vpop.f32.mrf.mxu1  ;;  %v1659_v12 = vunpack.c.l.b16 %v1604_v54 }
  0xf6   : > { %v1157_v53 = vadd.f32 %v1121_v44, %v959_v49  ;;  %v698_v13 = vadd.f32 %v697_v52, %v4547_v8  ;;  %v2429_v8 = vrot.slane %v4674_v57, 5  ;;  %v2105_v57 = vsel %vm4053_vm2, %v2100_v47, %v2104_v46 }
  0xf7   : > { %v2115_v49 = vsel %vm4053_vm2, %v2110_v14, %v2114_v20  ;;  %v3472_v44 = vrot.slane %v3464_v62, 9  ;;  %v2122_v52 = vrot.slane %v2120_v2, 5 }
  0xf8   : > { %1751 = vmatmul.bf16.gmra.mxu1 %v1671_v5  ;;  %1949 = vmatmul.bf16.gmra.mxu2 %v3602_v3  ;;  %v4708_v32 = vadd.f32 %v1499_v15, %v1157_v53  ;;  %v1607_v5 = vsel %vm4258_vm5, %v1605_v29, %v1606_v21  ;;  %v2431_v58 = vrot.slane %v2429_v8, 4  ;;  %v4727_v53 = vld [vmem:[%s4021_s28 + $0x50] sm:$0x1]  ;;  %v2236_v28 = vunpack.c.l.b16 %v2115_v49 }
  0xf9   : > { %v1502_v34 = vpop.f32.mrf.mxu0  ;;  %v1660_v37 = vunpack.c.l.b16 %v1607_v5  ;;  %v1610_v29 = vrot.slane %v4432_v56, 5  ;;  %v2123_v47 = vor.u32 %v2122_v52, %v2119_v1  ;;  %v2136_v20 = vshll.u32 %v4727_v53, 16  ;;  %v3404_v1 = vld [vmem:[%s4021_s28 + $0x54] sm:$0xf] }
  0xfa   : > { %2327 = vmatmul.bf16.gmra.mxu3 %v2247_v11  ;;  %v4724_v11 = vrot.slane %v2126_v27, 5  ;;  %v2433_v36 = vsel %vm4258_vm5, %v2431_v58, %v2432_v61 }
  0xfb   : > { %v926_v25 = vpop.f32.mrf.mxu2  ;;  %v2486_v40 = vunpack.c.l.b16 %v2433_v36  ;;  %v1612_v54 = vrot.slane %v1610_v29, 4  ;;  %v2124_v5 = vrot.slane %v2123_v47, 4  ;;  %v2138_v49 = vrot.slane %v2136_v20, 5 }
  0xfc   : > { %v960_v60 = vadd.f32 %v926_v25, %v698_v13  ;;  %2577 = vmatmul.bf16.gmra.mxu0 %v2497_v42  ;;  %v2235_v13 = vunpack.c.l.b16 %v2105_v57  ;;  %v2133_v14 = vor.u32 %v2132_v45, %v4724_v11  ;;  %v1672_v25 = vpack.c.b16 %v1660_v37, %v1659_v12 }
  0xfd   : > { %v1124_v48 = vpop.f32.mrf.mxu3  ;;  %v699_v15 = vpop.f32.mrf.mxu1 }
  0xfe   : > { %v1158_v3 = vadd.f32 %v1124_v48, %v960_v60  ;;  %v700_v7 = vadd.f32 %v699_v15, %v4569_v0  ;;  %v2430_v0 = vsel %vm4258_vm5, %v3472_v44, %v2429_v8  ;;  %v2248_v27 = vpack.c.b16 %v2236_v28, %v2235_v13 }
  0xff   : > { %v2485_v8 = vunpack.c.l.b16 %v2430_v0  ;;  %v3239_v48 = vrot.slane %v3231_v18, 9  ;;  %v1613_v15 = vrot.slane %v4445_v16, 5  ;;  %v2134_v57 = vrot.slane %v2133_v14, 4 }
 0x100   : > { %v4729_v46 = vadd.f32 %v1502_v34, %v1158_v3  ;;  %v2436_v44 = vrot.slane %v4706_v51, 5  ;;  %v2129_v51 = vsel %vm4053_vm2, %v2124_v5, %v4724_v11  ;;  %v2439_v0 = vrot.slane %v4727_v53, 5 }
 0x101   : > { %v1504_v42 = vpop.f32.mrf.mxu0  ;;  %v2498_v3 = vpack.c.b16 %v2486_v40, %v2485_v8  ;;  %v1611_v16 = vsel %vm4258_vm5, %v3239_v48, %v1610_v29  ;;  %v1614_v45 = vsel %vm4258_vm5, %v1612_v54, %v1613_v15  ;;  %v2139_v12 = vsel %vm4053_vm2, %v2134_v57, %v2138_v49  ;;  %v3604_v57 = vld [vmem:[%s4021_s28 + $0x48] sm:$0xff] }
 0x102   : > { %v2144_v29 = vshll.u32 %v3404_v1, 16  ;;  %v1661_v20 = vunpack.c.l.b16 %v1611_v16 }
 0x103   : > { %v928_v21 = vpop.f32.mrf.mxu2 }
 0x104   : > { %v961_v34 = vadd.f32 %v928_v21, %v700_v7  ;;  %v3465_v7 = vld [vmem:[%s4021_s28 + $0x48] sm:$0xe]  ;;  %v2141_v21 = vshrl.u32 %v3404_v1, 16  ;;  %v2146_v8 = vrot.slane %v2144_v29, 5 }
 0x105   : > { %v1126_v62 = vpop.f32.mrf.mxu3  ;;  %v702_v2 = vpop.f32.mrf.mxu1  ;;  %v3473_v28 = vrot.slane %v3465_v7, 9  ;;  %v1617_v7 = vrot.slane %v4459_v30, 5 }
 0x106   : > { %v1159_v60 = vadd.f32 %v1126_v62, %v961_v34  ;;  %v703_v56 = vadd.f32 %v702_v2, %v4589_v35  ;;  %v4748_v35 = vld [vmem:[%s4021_s28 + $0x58] sm:$0xf]  ;;  %v1662_v34 = vunpack.c.l.b16 %v1614_v45  ;;  %v2237_v62 = vunpack.c.l.b16 %v2129_v51 }
 0x107   : > { %v2150_v18 = vshll.u32 %v4748_v35, 16  ;;  %v2154_v47 = vshrl.u32 %v4748_v35, 16  ;;  %v2437_v53 = vsel %vm4258_vm5, %v3473_v28, %v2436_v44  ;;  %v1620_v28 = vrot.slane %v4480_v6, 5 }
 0x108   : > { %1756 = vmatmul.bf16.gmra.mxu1 %v1672_v25  ;;  %1954 = vmatmul.bf16.gmra.mxu2 %v3603_v23  ;;  %v4744_v58 = vadd.f32 %v1504_v42, %v1159_v60  ;;  %v2438_v42 = vrot.slane %v2436_v44, 4  ;;  %v2238_v25 = vunpack.c.l.b16 %v2139_v12  ;;  %v1673_v54 = vpack.c.b16 %v1662_v34, %v1661_v20  ;;  %v3466_v20 = vld [vmem:[%s4021_s28 + $0x54] sm:$0xe] }
 0x109   : > { %v1507_v61 = vpop.f32.mrf.mxu0  ;;  %v2152_v40 = vrot.slane %v2150_v18, 5  ;;  %v2156_v60 = vrot.slane %v2154_v47, 4  ;;  %v2487_v49 = vunpack.c.l.b16 %v2437_v53 }
 0x10a   : > { %2332 = vmatmul.bf16.gmra.mxu3 %v2248_v27  ;;  %v2440_v23 = vsel %vm4258_vm5, %v2438_v42, %v2439_v0  ;;  %v2143_v27 = vrot.slane %v2141_v21, 4  ;;  %v2249_v1 = vpack.c.b16 %v2238_v25, %v2237_v62  ;;  %v3407_v42 = vld [vmem:[%s4021_s28 + $0x60] sm:$0xf]  ;;  %v4779_v0 = vld [vmem:[%s4021_s28 + $0x64] sm:$0xf] }
 0x10b   : > { %v931_v52 = vpop.f32.mrf.mxu2  ;;  %v2488_v44 = vunpack.c.l.b16 %v2440_v23  ;;  %v2157_v16 = vor.u32 %v2156_v60, %v2152_v40  ;;  %v2165_v34 = vshrl.u32 %v3407_v42, 16  ;;  %v2168_v62 = vshll.u32 %v3407_v42, 16 }
 0x10c   : > { %v962_v37 = vadd.f32 %v931_v52, %v703_v56  ;;  %2582 = vmatmul.bf16.gmra.mxu0 %v2498_v3  ;;  %v3232_v3 = vld [vmem:[%s4021_s28 + $0x48] sm:$0xe]  ;;  %v2147_v52 = vor.u32 %v2146_v8, %v2143_v27  ;;  %v2174_v6 = vshll.u32 %v4779_v0, 16  ;;  %v2178_v25 = vshrl.u32 %v4779_v0, 16 }
 0x10d   : > { %v1129_v13 = vpop.f32.mrf.mxu3  ;;  %v704_v36 = vpop.f32.mrf.mxu1  ;;  %v3240_v12 = vrot.slane %v3232_v3, 9 }
 0x10e   : > { %v1160_v14 = vadd.f32 %v1129_v13, %v962_v37  ;;  %v705_v11 = vadd.f32 %v704_v36, %v4613_v9  ;;  %v4770_v9 = vld [vmem:[%s4021_s28 + $0x5c] sm:$0x1]  ;;  %v2499_v37 = vpack.c.b16 %v2488_v44, %v2487_v49  ;;  %v1619_v13 = vrot.slane %v1617_v7, 4 }
 0x10f   : > { %v2160_v45 = vshll.u32 %v4770_v9, 16  ;;  %v2148_v30 = vrot.slane %v2147_v52, 4  ;;  %v2158_v36 = vrot.slane %v2157_v16, 4  ;;  %v1618_v8 = vsel %vm4258_vm5, %v3240_v12, %v1617_v7 }
 0x110   : > { %v4767_v2 = vadd.f32 %v1507_v61, %v1160_v14  ;;  %v2443_v14 = vrot.slane %v4748_v35, 5  ;;  %v4797_v49 = vrot.slane %v2174_v6, 5  ;;  %v2180_v44 = vrot.slane %v2178_v25, 4 }
 0x111   : > { %v1509_v56 = vpop.f32.mrf.mxu0  ;;  %v2162_v21 = vrot.slane %v2160_v45, 5  ;;  %v2153_v35 = vsel %vm4053_vm2, %v2148_v30, %v2152_v40  ;;  %v1663_v3 = vunpack.c.l.b16 %v1618_v8  ;;  %v1624_v12 = vrot.slane %v4500_v59, 5 }
 0x112   : > { %v2239_v40 = vunpack.c.l.b16 %v2153_v35  ;;  %v2181_v42 = vor.u32 %v2180_v44, %v4797_v49  ;;  %v1627_v6 = vrot.slane %v4516_v50, 5 }
 0x113   : > { %v933_v48 = vpop.f32.mrf.mxu2  ;;  %v2163_v60 = vsel %vm4053_vm2, %v2158_v36, %v2162_v21  ;;  %v1626_v59 = vrot.slane %v1624_v12, 4 }
 0x114   : > { %v963_v15 = vadd.f32 %v933_v48, %v705_v11  ;;  %v3474_v48 = vrot.slane %v3466_v20, 9  ;;  %v2240_v52 = vunpack.c.l.b16 %v2163_v60 }
 0x115   : > { %v1131_v5 = vpop.f32.mrf.mxu3  ;;  %v707_v61 = vpop.f32.mrf.mxu1 }
 0x116   : > { %v1161_v51 = vadd.f32 %v1131_v5, %v963_v15  ;;  %v708_v18 = vadd.f32 %v707_v61, %v4563_v55  ;;  %v1621_v55 = vsel %vm4258_vm5, %v1619_v13, %v1620_v28  ;;  %v2446_v15 = vrot.slane %v4770_v9, 5  ;;  %v4800_v61 = vld [vmem:[%s4021_s28 + $0x68] sm:$0x1]  ;;  %v3233_v13 = vld [vmem:[%s4021_s28 + $0x54] sm:$0xe] }
 0x117   : > { %v2167_v5 = vrot.slane %v2165_v34, 4  ;;  %v1664_v7 = vunpack.c.l.b16 %v1621_v55  ;;  %v2444_v9 = vsel %vm4258_vm5, %v3474_v48, %v2443_v14  ;;  %v2184_v30 = vshll.u32 %v4800_v61, 16  ;;  %v3467_v55 = vld [vmem:[%s4021_s28 + $0x60] sm:$0xe]  ;;  %v3410_v48 = vld [vmem:[%s4021_s28 + $0x6c] sm:$0xf] }
 0x118   : > { %1761 = vmatmul.bf16.gmra.mxu1 %v1673_v54  ;;  %1959 = vmatmul.bf16.gmra.mxu2 %v3604_v57  ;;  %v4781_v29 = vadd.f32 %v1509_v56, %v1161_v51  ;;  %v2445_v54 = vrot.slane %v2443_v14, 4  ;;  %v2170_v57 = vrot.slane %v2168_v62, 5  ;;  %v2489_v14 = vunpack.c.l.b16 %v2444_v9 }
 0x119   : > { %v1512_v47 = vpop.f32.mrf.mxu0  ;;  %v3241_v62 = vrot.slane %v3233_v13, 9 }
 0x11a   : > { %2337 = vmatmul.bf16.gmra.mxu3 %v2249_v1  ;;  %v2447_v51 = vsel %vm4258_vm5, %v2445_v54, %v2446_v15  ;;  %v2171_v28 = vor.u32 %v2170_v57, %v2167_v5  ;;  %v4822_v54 = vld [vmem:[%s4021_s28 + $0x70] sm:$0xf]  ;;  %v1628_v5 = vsel %vm4258_vm5, %v1626_v59, %v1627_v6  ;;  %v3606_v6 = vld [vmem:[%s4021_s28 + $0x60] sm:$0xff] }
 0x11b   : > { %v936_v11 = vpop.f32.mrf.mxu2  ;;  %v2490_v20 = vunpack.c.l.b16 %v2447_v51  ;;  %v1625_v50 = vsel %vm4258_vm5, %v3241_v62, %v1624_v12  ;;  %v2198_v9 = vshll.u32 %v4822_v54, 16  ;;  %v2202_v51 = vshrl.u32 %v4822_v54, 16 }
 0x11c   : > { %v964_v53 = vadd.f32 %v936_v11, %v708_v18  ;;  %2587 = vmatmul.bf16.gmra.mxu0 %v2499_v37  ;;  %v1674_v18 = vpack.c.b16 %v1664_v7, %v1663_v3  ;;  %v2250_v11 = vpack.c.b16 %v2240_v52, %v2239_v40  ;;  %v2172_v25 = vrot.slane %v2171_v28, 4 }
 0x11d   : > { %v1134_v23 = vpop.f32.mrf.mxu3  ;;  %v709_v27 = vpop.f32.mrf.mxu1  ;;  %v2500_v8 = vpack.c.b16 %v2490_v20, %v2489_v14  ;;  %v3475_v3 = vrot.slane %v3467_v55, 9  ;;  %v2453_v40 = vrot.slane %v4800_v61, 5  ;;  %v3412_v14 = vld [vmem:[%s4021_s28 + $0x74] sm:$0x1]  ;;  %v3234_v55 = vld [vmem:[%s4021_s28 + $0x60] sm:$0xe] }
 0x11e   : > { %v1162_v56 = vadd.f32 %v1134_v23, %v964_v53  ;;  %v710_v16 = vadd.f32 %v709_v27, %v4582_v22  ;;  %v3605_v22 = vld [vmem:[%s4021_s28 + $0x54] sm:$0xff]  ;;  %v2182_v53 = vrot.slane %v2181_v42, 4  ;;  %v2186_v23 = vrot.slane %v2184_v30, 5 }
 0x11f   : > { %v2450_v27 = vrot.slane %v4779_v0, 5  ;;  %v2177_v0 = vsel %vm4053_vm2, %v2172_v25, %v4797_v49  ;;  %v1665_v49 = vunpack.c.l.b16 %v1625_v50  ;;  %v3242_v50 = vrot.slane %v3234_v55, 9 }
 0x120   : > { %v4802_v1 = vadd.f32 %v1512_v47, %v1162_v56  ;;  %v2187_v57 = vsel %vm4053_vm2, %v2182_v53, %v2186_v23  ;;  %v2241_v13 = vunpack.c.l.b16 %v2177_v0  ;;  %v1631_v23 = vrot.slane %v4535_v10, 5 }
 0x121   : > { %v1514_v45 = vpop.f32.mrf.mxu0  ;;  %v2452_v7 = vrot.slane %v2450_v27, 4  ;;  %v2242_v28 = vunpack.c.l.b16 %v2187_v57  ;;  %v2451_v42 = vsel %vm4258_vm5, %v3475_v3, %v2450_v27  ;;  %v1634_v57 = vrot.slane %v4553_v41, 5 }
 0x122   : > { %v2491_v25 = vunpack.c.l.b16 %v2451_v42 }
 0x123   : > { %v938_v37 = vpop.f32.mrf.mxu2  ;;  %v2454_v61 = vsel %vm4258_vm5, %v2452_v7, %v2453_v40  ;;  %v2457_v40 = vrot.slane %v4822_v54, 5 }
 0x124   : > { %v965_v36 = vadd.f32 %v938_v37, %v710_v16  ;;  %v2189_v16 = vshrl.u32 %v3410_v48, 16  ;;  %v1666_v37 = vunpack.c.l.b16 %v1628_v5  ;;  %v2492_v53 = vunpack.c.l.b16 %v2454_v61 }
 0x125   : > { %v1136_v21 = vpop.f32.mrf.mxu3  ;;  %v712_v47 = vpop.f32.mrf.mxu1  ;;  %v1633_v5 = vrot.slane %v1631_v23, 4 }
 0x126   : > { %v1163_v34 = vadd.f32 %v1136_v21, %v965_v36  ;;  %v713_v60 = vadd.f32 %v712_v47, %v4601_v19  ;;  %v2191_v36 = vrot.slane %v2189_v16, 4  ;;  %v3468_v16 = vld [vmem:[%s4021_s28 + $0x6c] sm:$0xe] }
 0x127   : > { %v1635_v41 = vsel %vm4258_vm5, %v1633_v5, %v1634_v57  ;;  %v3476_v54 = vrot.slane %v3468_v16, 9 }
 0x128   : > { %1766 = vmatmul.bf16.gmra.mxu1 %v1674_v18  ;;  %1964 = vmatmul.bf16.gmra.mxu2 %v3605_v22  ;;  %v4817_v35 = vadd.f32 %v1514_v45, %v1163_v34  ;;  %v2192_v45 = vshll.u32 %v3410_v48, 16  ;;  %v2200_v18 = vrot.slane %v2198_v9, 5  ;;  %v2204_v22 = vrot.slane %v2202_v51, 4 }
 0x129   : > { %v1517_v56 = vpop.f32.mrf.mxu0  ;;  %v1675_v34 = vpack.c.b16 %v1666_v37, %v1665_v49  ;;  %v2208_v48 = vshll.u32 %v3412_v14, 16  ;;  %v1668_v61 = vunpack.c.l.b16 %v1635_v41 }
 0x12a   : > { %2342 = vmatmul.bf16.gmra.mxu3 %v2250_v11  ;;  %v2194_v21 = vrot.slane %v2192_v45, 5 }
 0x12b   : > { %v941_v15 = vpop.f32.mrf.mxu2 }
 0x12c   : > { %v966_v44 = vadd.f32 %v941_v15, %v713_v60  ;;  %2592 = vmatmul.bf16.gmra.mxu0 %v2500_v8  ;;  %v2251_v8 = vpack.c.b16 %v2242_v28, %v2241_v13  ;;  %v2195_v60 = vor.u32 %v2194_v21, %v2191_v36  ;;  %v2459_v13 = vrot.slane %v2457_v40, 4 }
 0x12d   : > { %v1139_v19 = vpop.f32.mrf.mxu3  ;;  %v714_v52 = vpop.f32.mrf.mxu1  ;;  %v2460_v28 = vrot.slane %v3412_v14, 5  ;;  %v3607_v14 = vld [vmem:[%s4021_s28 + $0x6c] sm:$0xff]  ;;  %s4880_s28 = sand.u32 1, %s3887_s13  }
 0x12e   : > { %v1164_v12 = vadd.f32 %v1139_v19, %v966_v44  ;;  %v715_v47 = vadd.f32 %v714_v52, %v4624_v38  ;;  %v2501_v38 = vpack.c.b16 %v2492_v53, %v2491_v25  ;;  %v2196_v44 = vrot.slane %v2195_v60, 4  ;;  %s2883_s11 = sshll.u32 %s4880_s28, 6 }
 0x12f   : > { %v2210_v19 = vrot.slane %v2208_v48, 5  ;;  %v2461_v31 = vsel %vm4258_vm5, %v2459_v13, %v2460_v28  ;;  %s4884_s20 = scalar_lea.vmem [#allocation2], %s2883_s11  ;;  %s2718_s11 = scalar_lea.sflag [#allocation3], %s4880_s28 }
 0x130   : > { %v4840_v30 = vadd.f32 %v1517_v56, %v1164_v12  ;;  %v2205_v56 = vor.u32 %v2204_v22, %v2200_v18  ;;  %v1632_v12 = vsel %vm4258_vm5, %v3242_v50, %v1631_v23  ;;  %v2201_v49 = vsel %vm4053_vm2, %v2196_v44, %v2200_v18  ;;  %s2738_s7 = sshll.u32 %s4884_s20, 4  ;;  %s4912_s7 = int_to_ptr.vmem [resolvable:$true] %s2738_s7 }
 0x131   : > { %v1519_v11 = vpop.f32.mrf.mxu0  ;;  %v1667_v42 = vunpack.c.l.b16 %v1632_v12  ;;  %v2243_v21 = vunpack.c.l.b16 %v2201_v49  ;;  %v2458_v18 = vsel %vm4258_vm5, %v3476_v54, %v2457_v40  ;;  %v2494_v23 = vunpack.c.l.b16 %v2461_v31 }
 0x132   : > { %v2206_v10 = vrot.slane %v2205_v56, 4  ;;  %v2493_v53 = vunpack.c.l.b16 %v2458_v18 }
 0x133   : > { %v943_v20 = vpop.f32.mrf.mxu2 }
 0x134   : > { %v967_v62 = vadd.f32 %v943_v20, %v715_v47 }
 0x135   : > { %v1141_v59 = vpop.f32.mrf.mxu3  ;;  %v717_v27 = vpop.f32.mrf.mxu1 }
 0x136   : > { %v1165_v15 = vadd.f32 %v1141_v59, %v967_v62  ;;  %v718_v3 = vadd.f32 %v717_v27, %v4565_v39  ;;  %v2211_v39 = vsel %vm4053_vm2, %v2206_v10, %v2210_v19  ;;  %v1676_v59 = vpack.c.b16 %v1668_v61, %v1667_v42 }
 0x137   : > { %v2244_v22 = vunpack.c.l.b16 %v2211_v39 }
 0x138   : > { %1771 = vmatmul.bf16.gmra.mxu1 %v1675_v34  ;;  %1969 = vmatmul.bf16.gmra.mxu2 %v3606_v6  ;;  %v4847_v0 = vadd.f32 %v1519_v11, %v1165_v15 }
 0x139   : > { %v1522_v7 = vpop.f32.mrf.mxu0  ;;  %v2252_v25 = vpack.c.b16 %v2244_v22, %v2243_v21 }
 0x13a   : > { %2347 = vmatmul.bf16.gmra.mxu3 %v2251_v8  ;;  %v2502_v8 = vpack.c.b16 %v2494_v23, %v2493_v53 }
 0x13b   : > { %v946_v52 = vpop.f32.mrf.mxu2 }
 0x13c   : > { %v968_v45 = vadd.f32 %v946_v52, %v718_v3  ;;  %2597 = vmatmul.bf16.gmra.mxu0 %v2501_v38 }
 0x13d   : > { %v1144_v9 = vpop.f32.mrf.mxu3  ;;  %v719_v51 = vpop.f32.mrf.mxu1 }
 0x13e   : > { %v1166_v37 = vadd.f32 %v1144_v9, %v968_v45  ;;  %v720_v47 = vadd.f32 %v719_v51, %v4585_v26 }
 0x140   : > { %v4861_v36 = vadd.f32 %v1522_v7, %v1166_v37 }
 0x141   : > { %v1524_v11 = vpop.f32.mrf.mxu0 }
 0x143   : > { %v948_v20 = vpop.f32.mrf.mxu2 }
 0x144   : > { %v969_v34 = vadd.f32 %v948_v20, %v720_v47 }
 0x145   : > { %v1146_v62 = vpop.f32.mrf.mxu3  ;;  %v722_v6 = vpop.f32.mrf.mxu1 }
 0x146   : > { %v1167_v27 = vadd.f32 %v1146_v62, %v969_v34  ;;  %v723_v55 = vadd.f32 %v722_v6, %v4609_v17 }
 0x148   : > { %1776 = vmatmul.bf16.gmra.mxu1 %v1676_v59  ;;  %1974 = vmatmul.bf16.gmra.mxu2 %v3607_v14  ;;  %v4869_v26 = vadd.f32 %v1524_v11, %v1167_v27 }
 0x149   : > { %v1527_v63 = vpop.f32.mrf.mxu0 }
 0x14a   : > { %2352 = vmatmul.bf16.gmra.mxu3 %v2252_v25 }
 0x14b   : > { %v951_v60 = vpop.f32.mrf.mxu2 }
 0x14c   : > { %v970_v56 = vadd.f32 %v951_v60, %v723_v55  ;;  %2602 = vmatmul.bf16.gmra.mxu0 %v2502_v8 }
 0x14d   : > { %v1149_v48 = vpop.f32.mrf.mxu3  ;;  %v724_v15 = vpop.f32.mrf.mxu1 }
 0x14e   : > { %v1168_v38 = vadd.f32 %v1149_v48, %v970_v56  ;;  %v725_v5 = vadd.f32 %v724_v15, %v4626_v43 }
 0x150   : > { %v4872_v50 = vadd.f32 %v1527_v63, %v1168_v38 }
 0x151   : > { %v1529_v57 = vpop.f32.mrf.mxu0 }
 0x153   : > { %v953_v44 = vpop.f32.mrf.mxu2 }
 0x154   : > { %v971_v10 = vadd.f32 %v953_v44, %v725_v5 }
 0x155   : > { %v1151_v19 = vpop.f32.mrf.mxu3  ;;  %v1742_v3 = vpop.f32.mrf.mxu1 }
 0x156   : > { %v1169_v7 = vadd.f32 %v1151_v19, %v971_v10  ;;  %v1782_v52 = vadd.f32 %v1742_v3, %v4655_v33 }
 0x158   : > { %v4875_v40 = vadd.f32 %v1529_v57, %v1169_v7 }
 0x159   : > { %v2568_v17 = vpop.f32.mrf.mxu0 }
 0x15b   : > { %v1940_v16 = vpop.f32.mrf.mxu2 }
 0x15c   : > { %v1980_v9 = vadd.f32 %v1940_v16, %v1782_v52 }
 0x15d   : > { %v2318_v45 = vpop.f32.mrf.mxu3  ;;  %v1744_v51 = vpop.f32.mrf.mxu1 }
 0x15e   : > { %v2358_v12 = vadd.f32 %v2318_v45, %v1980_v9  ;;  %v1783_v41 = vadd.f32 %v1744_v51, %v4670_v4 }
 0x160   : > { %v2608_v54 = vadd.f32 %v2568_v17, %v2358_v12 }
 0x161   : > { %v2570_v43 = vpop.f32.mrf.mxu0 }
 0x162   : > { %v2677_v33 = vmul.f32 %v2608_v54, %v2608_v54 }
 0x163   : > { %v1942_v49 = vpop.f32.mrf.mxu2 }
 0x164   : > { %v1981_v39 = vadd.f32 %v1942_v49, %v1783_v41 }
 0x165   : > { %v2320_v37 = vpop.f32.mrf.mxu3  ;;  %v1747_v13 = vpop.f32.mrf.mxu1 }
 0x166   : > { %v2359_v28 = vadd.f32 %v2320_v37, %v1981_v39  ;;  %v1784_v47 = vadd.f32 %v1747_v13, %v4693_v24 }
 0x168   : > { %v2609_v42 = vadd.f32 %v2570_v43, %v2359_v28 }
 0x169   : > { %v2573_v11 = vpop.f32.mrf.mxu0 }
 0x16a   : > { %v3636_v61 = vpack.c.bf16 %v2609_v42, %v2608_v54  ;;  %v2656_v21 = vadd.f32 %v2609_v42, %v2608_v54  ;;  %v2678_v22 = vmul.f32 %v2609_v42, %v2609_v42 }
 0x16b   : > { %v1945_v4 = vpop.f32.mrf.mxu2 }
 0x16c   : > { %3637 = vst [vmem:[%s4884_s20] sm:$0xff] %v3636_v61   ;;  %v2693_v18 = vadd.f32 %v2678_v22, %v2677_v33  ;;  %v1982_v31 = vadd.f32 %v1945_v4, %v1784_v47 }
 0x16d   : > { %v2323_v20 = vpop.f32.mrf.mxu3  ;;  %v1749_v34 = vpop.f32.mrf.mxu1 }
 0x16e   : > { %v2360_v62 = vadd.f32 %v2323_v20, %v1982_v31  ;;  %v1785_v25 = vadd.f32 %v1749_v34, %v4708_v32 }
 0x170   : > { %v2610_v59 = vadd.f32 %v2573_v11, %v2360_v62 }
 0x171   : > { %v2575_v53 = vpop.f32.mrf.mxu0 }
 0x172   : > { %v2657_v14 = vadd.f32 %v2656_v21, %v2610_v59  ;;  %v2679_v6 = vmul.f32 %v2610_v59, %v2610_v59 }
 0x173   : > { %v1947_v23 = vpop.f32.mrf.mxu2 }
 0x174   : > { %v2694_v24 = vadd.f32 %v2693_v18, %v2679_v6  ;;  %v1983_v27 = vadd.f32 %v1947_v23, %v1785_v25 }
 0x175   : > { %v2325_v8 = vpop.f32.mrf.mxu3  ;;  %v1752_v55 = vpop.f32.mrf.mxu1 }
 0x176   : > { %v2361_v63 = vadd.f32 %v2325_v8, %v1983_v27  ;;  %v1786_v38 = vadd.f32 %v1752_v55, %v4729_v46 }
 0x178   : > { %v2611_v60 = vadd.f32 %v2575_v53, %v2361_v63 }
 0x179   : > { %v2578_v5 = vpop.f32.mrf.mxu0 }
 0x17a   : > { %v3641_v56 = vpack.c.bf16 %v2611_v60, %v2610_v59  ;;  %v2658_v48 = vadd.f32 %v2657_v14, %v2611_v60  ;;  %v2680_v15 = vmul.f32 %v2611_v60, %v2611_v60 }
 0x17b   : > { %v1950_v57 = vpop.f32.mrf.mxu2 }
 0x17c   : > { %3673 = vst [vmem:[%s4884_s20 + $0x8] sm:$0xff] %v3641_v56   ;;  %v2695_v44 = vadd.f32 %v2694_v24, %v2680_v15  ;;  %v1984_v10 = vadd.f32 %v1950_v57, %v1786_v38 }
 0x17d   : > { %v2328_v19 = vpop.f32.mrf.mxu3  ;;  %v1754_v32 = vpop.f32.mrf.mxu1 }
 0x17e   : > { %v2362_v3 = vadd.f32 %v2328_v19, %v1984_v10  ;;  %v1787_v16 = vadd.f32 %v1754_v32, %v4744_v58 }
 0x180   : > { %v2612_v7 = vadd.f32 %v2578_v5, %v2362_v3 }
 0x181   : > { %v2580_v45 = vpop.f32.mrf.mxu0 }
 0x182   : > { %v2659_v17 = vadd.f32 %v2658_v48, %v2612_v7  ;;  %v2681_v52 = vmul.f32 %v2612_v7, %v2612_v7 }
 0x183   : > { %v1952_v9 = vpop.f32.mrf.mxu2 }
 0x184   : > { %v2696_v51 = vadd.f32 %v2695_v44, %v2681_v52  ;;  %v1985_v12 = vadd.f32 %v1952_v9, %v1787_v16 }
 0x185   : > { %v2330_v41 = vpop.f32.mrf.mxu3  ;;  %v1757_v46 = vpop.f32.mrf.mxu1 }
 0x186   : > { %v2363_v43 = vadd.f32 %v2330_v41, %v1985_v12  ;;  %v1788_v13 = vadd.f32 %v1757_v46, %v4767_v2 }
 0x188   : > { %v2613_v49 = vadd.f32 %v2580_v45, %v2363_v43 }
 0x189   : > { %v2583_v28 = vpop.f32.mrf.mxu0 }
 0x18a   : > { %v3646_v39 = vpack.c.bf16 %v2613_v49, %v2612_v7  ;;  %v2660_v37 = vadd.f32 %v2659_v17, %v2613_v49  ;;  %v2682_v54 = vmul.f32 %v2613_v49, %v2613_v49 }
 0x18b   : > { %v1955_v42 = vpop.f32.mrf.mxu2 }
 0x18c   : > { %3674 = vst [vmem:[%s4884_s20 + $0x10] sm:$0xff] %v3646_v39   ;;  %v2697_v33 = vadd.f32 %v2696_v51, %v2682_v54  ;;  %v1986_v61 = vadd.f32 %v1955_v42, %v1788_v13 }
 0x18d   : > { %v2333_v21 = vpop.f32.mrf.mxu3  ;;  %v1759_v58 = vpop.f32.mrf.mxu1 }
 0x18e   : > { %v2364_v22 = vadd.f32 %v2333_v21, %v1986_v61  ;;  %v1789_v18 = vadd.f32 %v1759_v58, %v4781_v29 }
 0x190   : > { %v2614_v47 = vadd.f32 %v2583_v28, %v2364_v22 }
 0x191   : > { %v2585_v31 = vpop.f32.mrf.mxu0 }
 0x192   : > { %v2661_v11 = vadd.f32 %v2660_v37, %v2614_v47  ;;  %v2683_v4 = vmul.f32 %v2614_v47, %v2614_v47 }
 0x193   : > { %v1957_v20 = vpop.f32.mrf.mxu2 }
 0x194   : > { %v2698_v34 = vadd.f32 %v2697_v33, %v2683_v4  ;;  %v1987_v62 = vadd.f32 %v1957_v20, %v1789_v18 }
 0x195   : > { %v2335_v59 = vpop.f32.mrf.mxu3  ;;  %v1762_v2 = vpop.f32.mrf.mxu1 }
 0x196   : > { %v2365_v14 = vadd.f32 %v2335_v59, %v1987_v62  ;;  %v1790_v24 = vadd.f32 %v1762_v2, %v4802_v1 }
 0x198   : > { %v2615_v6 = vadd.f32 %v2585_v31, %v2365_v14 }
 0x199   : > { %v2588_v27 = vpop.f32.mrf.mxu0 }
 0x19a   : > { %v3651_v25 = vpack.c.bf16 %v2615_v6, %v2614_v47  ;;  %v2662_v53 = vadd.f32 %v2661_v11, %v2615_v6  ;;  %v2684_v23 = vmul.f32 %v2615_v6, %v2615_v6 }
 0x19b   : > { %v1960_v8 = vpop.f32.mrf.mxu2 }
 0x19c   : > { %3675 = vst [vmem:[%s4884_s20 + $0x18] sm:$0xff] %v3651_v25   ;;  %v2699_v55 = vadd.f32 %v2698_v34, %v2684_v23  ;;  %v1988_v63 = vadd.f32 %v1960_v8, %v1790_v24 }
 0x19d   : > { %v2338_v60 = vpop.f32.mrf.mxu3  ;;  %v1764_v29 = vpop.f32.mrf.mxu1 }
 0x19e   : > { %v2366_v56 = vadd.f32 %v2338_v60, %v1988_v63  ;;  %v1791_v5 = vadd.f32 %v1764_v29, %v4817_v35 }
 0x1a0   : > { %v2616_v48 = vadd.f32 %v2588_v27, %v2366_v56 }
 0x1a1   : > { %v2590_v57 = vpop.f32.mrf.mxu0 }
 0x1a2   : > { %v2663_v15 = vadd.f32 %v2662_v53, %v2616_v48  ;;  %v2685_v38 = vmul.f32 %v2616_v48, %v2616_v48 }
 0x1a3   : > { %v1962_v44 = vpop.f32.mrf.mxu2 }
 0x1a4   : > { %v2700_v10 = vadd.f32 %v2699_v55, %v2685_v38  ;;  %v1989_v19 = vadd.f32 %v1962_v44, %v1791_v5 }
 0x1a5   : > { %v2340_v32 = vpop.f32.mrf.mxu3  ;;  %v1767_v1 = vpop.f32.mrf.mxu1 }
 0x1a6   : > { %v2367_v3 = vadd.f32 %v2340_v32, %v1989_v19  ;;  %v1792_v45 = vadd.f32 %v1767_v1, %v4840_v30 }
 0x1a8   : > { %v2617_v7 = vadd.f32 %v2590_v57, %v2367_v3 }
 0x1a9   : > { %v2593_v9 = vpop.f32.mrf.mxu0 }
 0x1aa   : > { %v3656_v17 = vpack.c.bf16 %v2617_v7, %v2616_v48  ;;  %v2664_v52 = vadd.f32 %v2663_v15, %v2617_v7  ;;  %v2686_v16 = vmul.f32 %v2617_v7, %v2617_v7 }
 0x1ab   : > { %v1965_v51 = vpop.f32.mrf.mxu2 }
 0x1ac   : > { %3676 = vst [vmem:[%s4884_s20 + $0x20] sm:$0xff] %v3656_v17   ;;  %v2701_v12 = vadd.f32 %v2700_v10, %v2686_v16  ;;  %v1990_v41 = vadd.f32 %v1965_v51, %v1792_v45 }
 0x1ad   : > { %v2343_v46 = vpop.f32.mrf.mxu3  ;;  %v1769_v35 = vpop.f32.mrf.mxu1 }
 0x1ae   : > { %v2368_v43 = vadd.f32 %v2343_v46, %v1990_v41  ;;  %v1793_v54 = vadd.f32 %v1769_v35, %v4847_v0 }
 0x1b0   : > { %v2618_v49 = vadd.f32 %v2593_v9, %v2368_v43 }
 0x1b1   : > { %v2595_v13 = vpop.f32.mrf.mxu0 }
 0x1b2   : > { %v2665_v39 = vadd.f32 %v2664_v52, %v2618_v49  ;;  %v2687_v37 = vmul.f32 %v2618_v49, %v2618_v49 }
 0x1b3   : > { %v1967_v28 = vpop.f32.mrf.mxu2 }
 0x1b4   : > { %v2702_v42 = vadd.f32 %v2701_v12, %v2687_v37  ;;  %v1991_v33 = vadd.f32 %v1967_v28, %v1793_v54 }
 0x1b5   : > { %v2345_v61 = vpop.f32.mrf.mxu3  ;;  %v1772_v30 = vpop.f32.mrf.mxu1 }
 0x1b6   : > { %v2369_v21 = vadd.f32 %v2345_v61, %v1991_v33  ;;  %v1794_v4 = vadd.f32 %v1772_v30, %v4861_v36 }
 0x1b8   : > { %v2619_v58 = vadd.f32 %v2595_v13, %v2369_v21 }
 0x1b9   : > { %v2598_v18 = vpop.f32.mrf.mxu0 }
 0x1ba   : > { %v3661_v22 = vpack.c.bf16 %v2619_v58, %v2618_v49  ;;  %v2666_v47 = vadd.f32 %v2665_v39, %v2619_v58  ;;  %v2688_v11 = vmul.f32 %v2619_v58, %v2619_v58 }
 0x1bb   : > { %v1970_v31 = vpop.f32.mrf.mxu2 }
 0x1bc   : > { %3677 = vst [vmem:[%s4884_s20 + $0x28] sm:$0xff] %v3661_v22   ;;  %v2703_v20 = vadd.f32 %v2702_v42, %v2688_v11  ;;  %v1992_v34 = vadd.f32 %v1970_v31, %v1794_v4 }
 0x1bd   : > { %v2348_v62 = vpop.f32.mrf.mxu3  ;;  %v1774_v0 = vpop.f32.mrf.mxu1 }
 0x1be   : > { %v2370_v59 = vadd.f32 %v2348_v62, %v1992_v34  ;;  %v1795_v25 = vadd.f32 %v1774_v0, %v4869_v26 }
 0x1c0   : > { %v2620_v2 = vadd.f32 %v2598_v18, %v2370_v59 }
 0x1c1   : > { %v2600_v53 = vpop.f32.mrf.mxu0 }
 0x1c2   : > { %v2667_v14 = vadd.f32 %v2666_v47, %v2620_v2  ;;  %v2689_v6 = vmul.f32 %v2620_v2, %v2620_v2 }
 0x1c3   : > { %v1972_v23 = vpop.f32.mrf.mxu2 }
 0x1c4   : > { %v2704_v24 = vadd.f32 %v2703_v20, %v2689_v6  ;;  %v1993_v36 = vadd.f32 %v1972_v23, %v1795_v25 }
 0x1c5   : > { %v2350_v27 = vpop.f32.mrf.mxu3  ;;  %v1777_v8 = vpop.f32.mrf.mxu1 }
 0x1c6   : > { %v2371_v55 = vadd.f32 %v2350_v27, %v1993_v36  ;;  %v1796_v48 = vadd.f32 %v1777_v8, %v4872_v50 }
 0x1c8   : > { %v2621_v63 = vadd.f32 %v2600_v53, %v2371_v55 }
 0x1c9   : > { %v2603_v57 = vpop.f32.mrf.mxu0 }
 0x1ca   : > { %v3666_v60 = vpack.c.bf16 %v2621_v63, %v2620_v2  ;;  %v2668_v29 = vadd.f32 %v2667_v14, %v2621_v63  ;;  %v2690_v56 = vmul.f32 %v2621_v63, %v2621_v63 }
 0x1cb   : > { %v1975_v15 = vpop.f32.mrf.mxu2 }
 0x1cc   : > { %3678 = vst [vmem:[%s4884_s20 + $0x30] sm:$0xff] %v3666_v60   ;;  %v2705_v38 = vadd.f32 %v2704_v24, %v2690_v56  ;;  %v1994_v26 = vadd.f32 %v1975_v15, %v1796_v48 }
 0x1cd   : > { %v2353_v5 = vpop.f32.mrf.mxu3  ;;  %v1779_v10 = vpop.f32.mrf.mxu1 }
 0x1ce   : > { %v2372_v44 = vadd.f32 %v2353_v5, %v1994_v26  ;;  %v1797_v3 = vadd.f32 %v1779_v10, %v4875_v40 }
 0x1d0   : > { %v2622_v19 = vadd.f32 %v2603_v57, %v2372_v44 }
 0x1d1   : > { %v2605_v45 = vpop.f32.mrf.mxu0 }
 0x1d2   : > { %v2669_v32 = vadd.f32 %v2668_v29, %v2622_v19  ;;  %v2691_v1 = vmul.f32 %v2622_v19, %v2622_v19 }
 0x1d3   : > { %v1977_v50 = vpop.f32.mrf.mxu2 }
 0x1d4   : > { %v2706_v7 = vadd.f32 %v2705_v38, %v2691_v1  ;;  %v1995_v17 = vadd.f32 %v1977_v50, %v1797_v3 }
 0x1d5   : > { %v2355_v52 = vpop.f32.mrf.mxu3 }
 0x1d6   : > { %v2373_v16 = vadd.f32 %v2355_v52, %v1995_v17 }
 0x1d8   : > { %v2623_v9 = vadd.f32 %v2605_v45, %v2373_v16 }
 0x1da   : > { %v3671_v40 = vpack.c.bf16 %v2623_v9, %v2622_v19  ;;  %v2670_v51 = vadd.f32 %v2669_v32, %v2623_v9  ;;  %v2692_v12 = vmul.f32 %v2623_v9, %v2623_v9 }
 0x1dc   : > { %3679 = vst [vmem:[%s4884_s20 + $0x38] sm:$0xff] %v3671_v40   ;;  %v2671_v41 = vrot.slane %v2670_v51, 4  ;;  %v2707_v46 = vadd.f32 %v2706_v7, %v2692_v12 }
 0x1dd   : > { %3812 = shalt.err (!%p3809_p6)
}
 0x1de   : > { %s3913_s15 = smov 64   ;;  %s3914_s20 = smov 4   ;;  %v2672_v35 = vadd.f32 %v2671_v41, %v2670_v51  ;;  %v2708_v43 = vrot.slane %v2707_v46, 4  ;;  %vm2714_vm6 = vcmask 1040384  }
 0x1df   : > { %3705 = dma.vmem_to_hbm [thread:$0]  (%p3986_p3), %s4912_s7, 1024, %s2741_s8, %s2718_s11, %s3913_s15, %s3913_s15, %s3914_s20  }
 0x1e0   : > { %v2673_v49 = vrot.slane %v2672_v35, 2  ;;  %v2709_v39 = vadd.f32 %v2708_v43, %v2707_v46  ;;  %s2884_s6 = sshll.u32 %s4880_s28, 1  ;;  %s3532_s9 = sshll.u32 %s2753_s10, 1 }
 0x1e1   : > { %s2755_s27 = scalar_lea.hbm %s4975_s3, %s3532_s9  ;;  %s190_s29 = scalar_lea.vmem [#allocation4], %s2884_s6 }
 0x1e2   : > { %v2674_v37 = vadd.f32 %v2673_v49, %v2672_v35  ;;  %v2710_v54 = vrot.slane %v2709_v39, 2  ;;  %s2757_s16 = sshll.u32 %s190_s29, 4  ;;  %s2759_s7 = sshll.u32 %s2755_s27, 4  ;;  %s2758_s16 = int_to_ptr.vmem [resolvable:$true] %s2757_s16  ;;  %s2760_s7 = int_to_ptr.hbm [resolvable:$true] %s2759_s7 }
 0x1e3   : > { %s2723_s8 = scalar_lea.sflag [#allocation5], %s4880_s28  ;;  %s3827_s10 = sshra.s32 %s2760_s7, 4  ;;  %s3828_s10 = int_to_ptr.hbm [resolvable:$true] %s3827_s10 }
 0x1e4   : > { %v2675_v13 = vrot.slane %v2674_v37, 1  ;;  %v2711_v28 = vadd.f32 %v2710_v54, %v2709_v39  ;;  %s3829_s11 = scalar_lea.hbm %s3828_s10, 2  ;;  %s3833_s15 = scalar_lea.hbm %s4975_s3, 8 }
 0x1e5   : > { %p3830_p7 = scmp.ne.s32.totalorder %s3828_s10, %s3829_s11  ;;  %p3834_p11 = scmp.lt.s32.totalorder %s3828_s10, %s4975_s3 }
 0x1e6   : > { %v2712_v42 = vrot.slane %v2711_v28, 1  ;;  %v2676_v33 = vadd.f32 %v2675_v13, %v2674_v37  ;;  %p3835_p12 = scmp.lt.s32.totalorder %s3833_s15, %s3829_s11 }
 0x1e7   : > { %p3831_p9 = pnand %p3830_p7, %p3986_p3 }
 0x1e8   : > { %v2713_v61 = vadd.f32 %v2712_v42, %v2711_v28  ;;  %p3836_p13 = por %p3835_p12, %p3834_p11 }
 0x1e9   : > { %p3832_p10 = pneg %p3831_p9 }
 0x1ea   : > { %v2715_v30 = vsel %vm2714_vm6, %v2676_v33, %v2713_v61 }
 0x1eb   : > { %2716 = vst [vmem:[%s190_s29] sm:$0x3] %v2715_v30  ;;  %p3837_p0 = pnand %p3836_p13, %p3832_p10 }
 0x1ed   : > { %3840 = shalt.err (!%p3837_p0)
}
 0x1ee   : > { %3706 = dma.vmem_to_hbm [thread:$0]  (%p3986_p3), %s2758_s16, 32, %s2760_s7, %s2723_s8  }
 0x1ef PF: > { %p3716_p1 = scmp.ge.s32.totalorder %s3911_s19, 2  ;;  %s2771_s28 = sand.u32 1, %s3883_s12  }
 0x1f0   : > { %s2772_s9 = scalar_lea.sflag [#allocation3], %s2771_s28 }
 0x1f1   : > { %p3710_p2 = pnand %p3716_p1, %p3995_p8 }
 0x1f3   : > { %p3711_p4 = pneg %p3710_p2 }
 0x1f5   : > { %3874 = dma.done.wait (%p3711_p4), %s2772_s9, 1024  }
 0x1f6   : > { %3876 = vsyncadd (%p3711_p4), %s2772_s9, 4294966272  ;;  %s2782_s21 = scalar_lea.sflag [#allocation5], %s2771_s28 }
 0x1f7   : > { %3878 = dma.done.wait (%p3711_p4), %s2782_s21, 32  }
 0x1f8   : > { %3880 = vsyncadd (%p3711_p4), %s2782_s21, 4294967264  ;;  %s20_s19 = sadd.s32 1, %s3911_s19   ;;  %s4982_s12 = smov %s3887_s13 }
 0x1f9   : > { %p17_p5 = scmp.ge.s32.totalorder %s20_s19, 6   ;;  %s4983_s13 = smov %s3891_s14 }
 0x1fa   : > { %s4984_s14 = smov %s4004_s30  ;;  %s4985_s15 = smov %s3903_s17 }
 0x1fb   : > { %s4986_s16 = smov %s3907_s18  ;;  %s4987_s17 = smov %s4990_s22 }
 0x1fc   : > { %s4988_s18 = smov %s4994_s23  ;;  %19 = sbr.rel (!%p17_p5) target bundleno = 7 (0x7), region = 91 }
 0x201   :  { %2788 = vsyncpa [#allocation3], 1 }
 0x202   :  { %2790 = vsyncpa [#allocation3 + $0x1], 1 }
 0x203   :  { %2791 = vsyncpa [#allocation5], 1 }
 0x204   :  { %2793 = vsyncpa [#allocation5 + $0x1], 1 }

</bundles_post_ra>
